<compile_context>
chip_gen: v7x
topology: tpu7x:2x2x1
jax: 0.10.0
libtpu: 0.0.40
codegen_flags: <defaults>
</compile_context>

<pallas_src>
import jax
import jax.numpy as jnp
from jax import lax  # noqa: F401  (kept for users extending the kernel)
from jax.experimental import pallas as pl
from jax.experimental.pallas import tpu as pltpu

LANE = 128
POOL_CHUNK = 16          # bf16 sublane pack; chunk size of the pooling loop


def _round_up(x, m):
    return ((x + m - 1) // m) * m


def _round_down(x, m):
    return (x // m) * m


# ----------------------------------------------------------------------------
# Pallas kernel: masked mean-pool (accumulated) -> neutralize -> fused head
# ----------------------------------------------------------------------------
def sentdebias_kernel(tok_ref, mask_ref, inv_ref, u_ref, ut_ref, w_ref, uw_ref,
                      logits_ref, emb_ref, acc_ref):
    """Grid = (batch tiles i, seq tiles j); j is the reduction axis (last).

    tok_ref   : (TB, TS, H) bf16  streamed token-embedding tile
    mask_ref  : (1, TB, TS) f32   binary attention-mask tile (0/1)
    inv_ref   : (TB, 1)     f32   1 / token-count per row (mean-pool scale)
    u_ref     : (H, KP)     bf16  zero-padded bias subspace U           (resident)
    ut_ref    : (KP, H)     bf16  U^T (precomputed, no in-kernel .T)    (resident)
    w_ref     : (H, CP)     bf16  zero-padded classifier weight         (resident)
    uw_ref    : (KP, CP)    bf16  U^T @ W (fused-head term)             (resident)
    logits_ref: (TB, CP)    f32   lane-dense logits (head bias added in wrapper)
    emb_ref   : (TB, H)     f32   debiased (neutralized) pooled embedding
    acc_ref   : (TB, H)     f32   pooled-sum accumulator (scratch)
    """
    j = pl.program_id(1)

    @pl.when(j == 0)
    def _init():
        acc_ref[...] = jnp.zeros_like(acc_ref)

    # ---- Masked-sum pooling over this sequence tile, chunked on sublanes ----
    # The 0/1 mask multiply stays in bf16 (exact); only the (TB, CHUNK, H)
    # product is widened to f32 for accumulation (f32 accumulator in VMEM).
    ts = tok_ref.shape[1]
    n_chunks = ts // POOL_CHUNK
    m_all = mask_ref[0].astype(jnp.bfloat16)                 # (TB, TS), exact 0/1

    acc = acc_ref[...]
    for c in range(n_chunks):                                # static, fully unrolled
        lo, hi = c * POOL_CHUNK, (c + 1) * POOL_CHUNK
        t = tok_ref[:, lo:hi, :]                             # (TB, CH, H) bf16
        part = t * m_all[:, lo:hi, None]                     # bf16 multiply
        acc = acc + jnp.sum(part.astype(jnp.float32), axis=1)
    acc_ref[...] = acc

    # ---- Finalize: mean scale, neutralize, fused classifier head -------------
    @pl.when(j == pl.num_programs(1) - 1)
    def _finalize():
        pooled = acc_ref[...] * inv_ref[...]                             # (TB, H) f32

        # bf16 operands feed the MXU single-pass; accumulation stays f32.
        pooled_bf = pooled.astype(jnp.bfloat16)
        coeff = jnp.dot(pooled_bf, u_ref[...],
                        preferred_element_type=jnp.float32)              # (TB, KP)
        coeff_bf = coeff.astype(jnp.bfloat16)

        # _neutralize: v - (v @ U) @ U^T
        proj = jnp.dot(coeff_bf, ut_ref[...],
                       preferred_element_type=jnp.float32)               # (TB, H)
        emb_ref[...] = pooled - proj

        # Classifier head, algebraically fused:
        #   (pooled - coeff @ U^T) @ W == pooled @ W - coeff @ (U^T @ W)
        logits_ref[...] = (
            jnp.dot(pooled_bf, w_ref[...], preferred_element_type=jnp.float32)
            - jnp.dot(coeff_bf, uw_ref[...], preferred_element_type=jnp.float32))


# ----------------------------------------------------------------------------
# Tiling / VMEM-budget helpers
# ----------------------------------------------------------------------------
def _vmem_budget_bytes():
    """Per-generation VMEM budget: ~3/4 of capacity (≈48 MiB v7x, ≈96 MiB v5e/v6e)."""
    try:
        cap = int(pltpu.get_tpu_info().vmem_capacity_bytes)
    except Exception:
        cap = 64 * 1024 * 1024        # most restrictive generation (v7x per-TC)
    return min((cap * 3) // 4, 112 * 1024 * 1024)


def _choose_tiles(B, S, H, stream_budget, tb_target=128, ts_target=256):
    """tb: multiple of 8 with >=2 batch tiles whenever B allows (fills both v7x
    TensorCores); ts: multiple of 16 (bf16 sublane pack).  Both shrink until
    the double-buffered bf16 token stream fits the budget."""
    B8 = _round_up(max(B, 1), 8)
    if B8 >= 16:
        tb = min(tb_target, max(8, _round_down(B8 // 2, 8)))
    else:
        tb = 8
    ts = min(_round_up(ts_target, 16), _round_up(max(S, 1), 16))

    def stream_bytes(tb_, ts_):
        # double-buffered bf16 token tile + f32 mask tile
        return 2 * (tb_ * ts_ * H * 2 + tb_ * ts_ * 4)

    while stream_bytes(tb, ts) > stream_budget and (ts > 16 or tb > 8):
        if ts >= tb and ts > 16:
            ts = max(16, _round_down(ts // 2, 16))
        elif tb > 8:
            tb = max(8, _round_down(tb // 2, 8))
        else:
            break
    return tb, ts


# ----------------------------------------------------------------------------
# Wrapper
# ----------------------------------------------------------------------------
def sent_debias_forward(token_embs, attention_mask, bias_subspace, head_w,
                        head_b, *, tb=None, ts=None):
    """token_embs: (B,S,H) float, attention_mask: (B,S) int/float,
       bias_subspace: (H,K), head_w: (H,C), head_b: (C,)"""
    B, S, H = token_embs.shape
    K = bias_subspace.shape[1]
    C = head_w.shape[1]

    vmem_budget = _vmem_budget_bytes()
    auto_tb, auto_ts = _choose_tiles(B, S, H, stream_budget=(vmem_budget * 3) // 5)
    tb = auto_tb if tb is None else max(8, _round_up(tb, 8))
    ts = auto_ts if ts is None else max(16, _round_up(ts, 16))

    B_pad = _round_up(B, tb)
    S_pad = _round_up(S, ts)
    nb, ns = B_pad // tb, S_pad // ts

    # bf16 token stream (halves the dominant HBM read); padded rows/cols are
    # zero and masked out, so the result is unchanged.
    tok_bf = token_embs.astype(jnp.bfloat16)
    if (B_pad, S_pad) != (B, S):
        tok_bf = jnp.pad(tok_bf, ((0, B_pad - B), (0, S_pad - S), (0, 0)))

    # Binary mask (f32 stream, cast to bf16 in-kernel) plus per-row f32
    # 1/count so the mean scale stays full precision.
    maskf = jnp.pad(attention_mask.astype(jnp.float32),
                    ((0, B_pad - B), (0, S_pad - S)))
    counts = jnp.maximum(jnp.sum(maskf, axis=1, keepdims=True), 1.0)
    inv_count = (1.0 / counts).astype(jnp.float32)                      # (B_pad, 1)
    mask_r = maskf.reshape(B_pad, ns, ts).transpose(1, 0, 2)            # (ns, B_pad, ts)

    # Zero-pad skinny matrices to 128 lanes (mathematically inert: padded
    # coeff / logit columns are exactly zero), precompute U^T and U^T@W in f32,
    # then cast the residents to bf16 for single-pass MXU matmuls.
    kp = _round_up(K, LANE)
    cp = _round_up(C, LANE)
    u_f32 = jnp.zeros((H, kp), jnp.float32).at[:, :K].set(
        bias_subspace.astype(jnp.float32))
    w_f32 = jnp.zeros((H, cp), jnp.float32).at[:, :C].set(
        head_w.astype(jnp.float32))
    ut_f32 = u_f32.T
    uw_f32 = ut_f32 @ w_f32
    u_pad = u_f32.astype(jnp.bfloat16)
    ut_pad = ut_f32.astype(jnp.bfloat16)
    w_pad = w_f32.astype(jnp.bfloat16)
    uw_pad = uw_f32.astype(jnp.bfloat16)

    cost = pl.CostEstimate(
        flops=int(2 * B_pad * S_pad * H
                  + 2 * B_pad * (H * kp + kp * H + H * cp + kp * cp)),
        transcendentals=0,
        bytes_accessed=int(B_pad * S_pad * H * 2            # bf16 tokens
                           + B_pad * S_pad * 4              # f32 mask
                           + (H * kp + kp * H + H * cp + kp * cp) * 2
                           + B_pad * (H + cp + 1) * 4))

    def run(single_buffer_residents):
        resident_kw = ({"pipeline_mode": pl.Buffered(1)}
                       if single_buffer_residents else {})
        return pl.pallas_call(
            sentdebias_kernel,
            out_shape=(
                jax.ShapeDtypeStruct((B_pad, cp), jnp.float32),
                jax.ShapeDtypeStruct((B_pad, H), jnp.float32),
            ),
            grid=(nb, ns),
            in_specs=[
                pl.BlockSpec((tb, ts, H), lambda i, j: (i, j, 0)),    # token stream
                pl.BlockSpec((1, tb, ts), lambda i, j: (j, i, 0)),    # mask tiles
                pl.BlockSpec((tb, 1), lambda i, j: (i, 0)),           # 1/count
                pl.BlockSpec((H, kp), lambda i, j: (0, 0), **resident_kw),   # U
                pl.BlockSpec((kp, H), lambda i, j: (0, 0), **resident_kw),   # U^T
                pl.BlockSpec((H, cp), lambda i, j: (0, 0), **resident_kw),   # W
                pl.BlockSpec((kp, cp), lambda i, j: (0, 0), **resident_kw),  # U^T@W
            ],
            out_specs=(
                pl.BlockSpec((tb, cp), lambda i, j: (i, 0)),
                pl.BlockSpec((tb, H), lambda i, j: (i, 0)),
            ),
            scratch_shapes=[pltpu.VMEM((tb, H), jnp.float32)],
            compiler_params=pltpu.CompilerParams(
                dimension_semantics=("parallel", "arbitrary"),
                vmem_limit_bytes=int(vmem_budget)),
            cost_estimate=cost,
        )(tok_bf, mask_r, inv_count, u_pad, ut_pad, w_pad, uw_pad)

    try:
        logits_pad, debiased = run(single_buffer_residents=True)
    except Exception:
        # Fallback for Pallas versions without Buffered(1) single-buffering of
        # resident operands (identical numerics, just more VMEM).
        logits_pad, debiased = run(single_buffer_residents=False)

    logits = logits_pad[:B, :C] + head_b.astype(jnp.float32)[None, :]
    return {"logits": logits, "debiased_embedding": debiased[:B]}


# ----------------------------------------------------------------------------
# Glue: PCA bias subspace and embedding lookup (plain JAX, outside the kernel)
# ----------------------------------------------------------------------------
def compute_bias_subspace(diff_embeddings, n_components):
    """PCA on counterfactual difference vectors -> (H, n_components)."""
    d = diff_embeddings - jnp.mean(diff_embeddings, axis=0, keepdims=True)
    _, _, vt = jnp.linalg.svd(d, full_matrices=False)
    return vt[:n_components].T               # (H, K)


def get_token_embeddings(emb_table, input_ids):
    # _get_embedding stand-in: token-embedding lookup (gather stays in JAX).
    return jnp.take(emb_table, input_ids, axis=0)   # (B, S, H)


if __name__ == "__main__":
    key = jax.random.PRNGKey(0)
    k_emb, k_ids, k_diff, k_w, k_b = jax.random.split(key, 5)

    # Small, deterministic synthetic configuration.
    B, S, H = 16, 32, 128   # batch, seq, hidden (lane-dense hidden)
    V = 64                  # vocab size
    C = 2                   # classifier output dim
    K = 2                   # n_components of the bias subspace
    N_PAIRS = 8             # number of counterfactual word pairs

    # "Model" parameters
    emb_table = jax.random.normal(k_emb, (V, H), dtype=jnp.float32) * 0.1
    head_w = jax.random.normal(k_w, (H, C), dtype=jnp.float32) * 0.1
    head_b = jax.random.normal(k_b, (C,), dtype=jnp.float32) * 0.01

    # Bias subspace from synthetic counterfactual embedding differences (PCA)
    diffs = jax.random.normal(k_diff, (N_PAIRS, H), dtype=jnp.float32)
    bias_subspace = compute_bias_subspace(diffs, K)          # (H, K)

    # Forward inputs
    input_ids = jax.random.randint(k_ids, (B, S), 0, V)
    attention_mask = jnp.ones((B, S), dtype=jnp.int32)
    attention_mask = attention_mask.at[1, 20:].set(0)
    attention_mask = attention_mask.at[5, 7:].set(0)
    attention_mask = attention_mask.at[11, 1:].set(0)

    token_embs = get_token_embeddings(emb_table, input_ids)  # (B, S, H)

    # ts=16 forces a multi-step sequence reduction (grid 2x2) even at this tiny
    # demo size; production sizes use the auto-chosen generation-sized tiles.
    out = sent_debias_forward(token_embs, attention_mask, bias_subspace,
                              head_w, head_b, ts=16)
    jax.block_until_ready(out)

    # Reference (plain JAX, f32) using the same bf16-streamed token embeddings.
    tok_f32 = token_embs.astype(jnp.bfloat16).astype(jnp.float32)
    m = attention_mask.astype(jnp.float32)
    counts = jnp.maximum(m.sum(axis=1, keepdims=True), 1.0)
    pooled_ref = jnp.einsum("bsh,bs->bh", tok_f32, m) / counts
    neut_ref = pooled_ref - (pooled_ref @ bias_subspace) @ bias_subspace.T
    logits_ref = neut_ref @ head_w + head_b

    # Tolerance covers the bf16 MXU operands (U/W/pooled); errors are ~1e-4.
    assert jnp.allclose(out["debiased_embedding"], neut_ref,
                        atol=2e-3, rtol=2e-3)
    assert jnp.allclose(out["logits"], logits_ref, atol=2e-3, rtol=2e-3)

    print("KERNEL_OK")
</pallas_src>

<mosaic_0001>
module attributes {stable_mosaic.version = 11 : i64} {
  func.func @sentdebias_kernel(%arg0: i32, %arg1: i32, %arg2: memref<8x16x128xbf16, #tpu.memory_space<vmem>>, %arg3: memref<1x8x16xf32, #tpu.memory_space<vmem>>, %arg4: memref<8x1xf32, #tpu.memory_space<vmem>>, %arg5: memref<128x128xbf16, #tpu.memory_space<vmem>>, %arg6: memref<128x128xbf16, #tpu.memory_space<vmem>>, %arg7: memref<128x128xbf16, #tpu.memory_space<vmem>>, %arg8: memref<128x128xbf16, #tpu.memory_space<vmem>>, %arg9: memref<8x128xf32, #tpu.memory_space<vmem>>, %arg10: memref<8x128xf32, #tpu.memory_space<vmem>>, %arg11: memref<8x128xf32, #tpu.memory_space<vmem>>) attributes {dimension_semantics = [#tpu.dimension_semantics<parallel>, #tpu.dimension_semantics<arbitrary>], iteration_bounds = array<i64: 2, 2>, scalar_prefetch = 0 : i64, scratch_operands = 1 : i64, tpu.core_type = #tpu.core_type<tc>, window_params = [{transform_indices = @transform_0, window_bounds = array<i64: 8, 16, 128>}, {transform_indices = @transform_1, window_bounds = array<i64: 1, 8, 16>}, {transform_indices = @transform_2, window_bounds = array<i64: 8, 1>}, {pipeline_mode = #tpu.pipeline_mode<synchronous>, transform_indices = @transform_3, window_bounds = array<i64: 128, 128>}, {pipeline_mode = #tpu.pipeline_mode<synchronous>, transform_indices = @transform_4, window_bounds = array<i64: 128, 128>}, {pipeline_mode = #tpu.pipeline_mode<synchronous>, transform_indices = @transform_5, window_bounds = array<i64: 128, 128>}, {pipeline_mode = #tpu.pipeline_mode<synchronous>, transform_indices = @transform_6, window_bounds = array<i64: 128, 128>}, {transform_indices = @transform_7, window_bounds = array<i64: 8, 128>}, {transform_indices = @transform_8, window_bounds = array<i64: 8, 128>}]} {
    %c0_i32 = arith.constant 0 : i32
    %0 = arith.cmpi eq, %arg1, %c0_i32 : i32
    %1 = arith.extui %0 : i1 to i32
    %c0_i32_0 = arith.constant 0 : i32
    %2 = arith.cmpi ne, %1, %c0_i32_0 : i32
    scf.if %2 {
      %cst_11 = arith.constant 0.000000e+00 : f32
      %18 = vector.broadcast %cst_11 : f32 to vector<8x128xf32>
      %c0_12 = arith.constant 0 : index
      %c0_13 = arith.constant 0 : index
      %19 = vector.load %arg11[%c0_12, %c0_13] : memref<8x128xf32, #tpu.memory_space<vmem>>, vector<8x128xf32>
      tpu.vector_store %arg11[%c0_12, %c0_13], %18 {strides = array<i32>} : memref<8x128xf32, #tpu.memory_space<vmem>>, vector<8x128xf32>,
    } else {
    }
    %c0 = arith.constant 0 : index
    %c0_1 = arith.constant 0 : index
    %c0_2 = arith.constant 0 : index
    %3 = vector.load %arg3[%c0, %c0_1, %c0_2] : memref<1x8x16xf32, #tpu.memory_space<vmem>>, vector<1x8x16xf32>
    %4 = vector.shape_cast %3 : vector<1x8x16xf32> to vector<8x16xf32>
    %5 = arith.truncf %4 : vector<8x16xf32> to vector<8x16xbf16>
    %c0_3 = arith.constant 0 : index
    %c0_4 = arith.constant 0 : index
    %6 = vector.load %arg11[%c0_3, %c0_4] : memref<8x128xf32, #tpu.memory_space<vmem>>, vector<8x128xf32>
    %c0_5 = arith.constant 0 : index
    %c0_6 = arith.constant 0 : index
    %c0_7 = arith.constant 0 : index
    %7 = vector.load %arg2[%c0_5, %c0_6, %c0_7] : memref<8x16x128xbf16, #tpu.memory_space<vmem>>, vector<8x16x128xbf16>
    %8 = vector.shape_cast %5 : vector<8x16xbf16> to vector<8x16x1xbf16>
    %9 = vector.broadcast %8 : vector<8x16x1xbf16> to vector<8x16x128xbf16>
    %10 = arith.mulf %7, %9 : vector<8x16x128xbf16>
    %11 = arith.extf %10 : vector<8x16x128xbf16> to vector<8x16x128xf32>
    %cst = arith.constant dense<0.000000e+00> : vector<8x128xf32>
    %12 = vector.multi_reduction <add>, %11, %cst [1] : vector<8x16x128xf32> to vector<8x128xf32>
    %13 = arith.addf %6, %12 : vector<8x128xf32>
    %c0_8 = arith.constant 0 : index
    %c0_9 = arith.constant 0 : index
    %14 = vector.load %arg11[%c0_8, %c0_9] : memref<8x128xf32, #tpu.memory_space<vmem>>, vector<8x128xf32>
    tpu.vector_store %arg11[%c0_8, %c0_9], %13 {strides = array<i32>} : memref<8x128xf32, #tpu.memory_space<vmem>>, vector<8x128xf32>,
    %c1_i32 = arith.constant 1 : i32
    %15 = arith.cmpi eq, %arg1, %c1_i32 : i32
    %16 = arith.extui %15 : i1 to i32
    %c0_i32_10 = arith.constant 0 : i32
    %17 = arith.cmpi ne, %16, %c0_i32_10 : i32
    scf.if %17 {
      %c0_11 = arith.constant 0 : index
      %c0_12 = arith.constant 0 : index
      %18 = vector.load %arg11[%c0_11, %c0_12] : memref<8x128xf32, #tpu.memory_space<vmem>>, vector<8x128xf32>
      %c0_13 = arith.constant 0 : index
      %c0_14 = arith.constant 0 : index
      %19 = vector.load %arg4[%c0_13, %c0_14] : memref<8x1xf32, #tpu.memory_space<vmem>>, vector<8x1xf32>
      %20 = vector.broadcast %19 : vector<8x1xf32> to vector<8x128xf32>
      %21 = arith.mulf %18, %20 : vector<8x128xf32>
      %22 = arith.truncf %21 : vector<8x128xf32> to vector<8x128xbf16>
      %c0_15 = arith.constant 0 : index
      %c0_16 = arith.constant 0 : index
      %23 = vector.load %arg5[%c0_15, %c0_16] : memref<128x128xbf16, #tpu.memory_space<vmem>>, vector<128x128xbf16>
      %cst_17 = arith.constant dense<0.000000e+00> : vector<8x128xf32>
      %24 = tpu.matmul %22, %23, %cst_17 {dimension_numbers = #tpu.dot_dimension_numbers<[1], [0], [0], [1], [0, 0, 1, 1], [], []>} : vector<8x128xbf16>, vector<128x128xbf16>, vector<8x128xf32> -> vector<8x128xf32>
      %25 = arith.truncf %24 : vector<8x128xf32> to vector<8x128xbf16>
      %c0_18 = arith.constant 0 : index
      %c0_19 = arith.constant 0 : index
      %26 = vector.load %arg6[%c0_18, %c0_19] : memref<128x128xbf16, #tpu.memory_space<vmem>>, vector<128x128xbf16>
      %cst_20 = arith.constant dense<0.000000e+00> : vector<8x128xf32>
      %27 = tpu.matmul %25, %26, %cst_20 {dimension_numbers = #tpu.dot_dimension_numbers<[1], [0], [0], [1], [0, 0, 1, 1], [], []>} : vector<8x128xbf16>, vector<128x128xbf16>, vector<8x128xf32> -> vector<8x128xf32>
      %28 = arith.subf %21, %27 : vector<8x128xf32>
      %c0_21 = arith.constant 0 : index
      %c0_22 = arith.constant 0 : index
      %29 = vector.load %arg10[%c0_21, %c0_22] : memref<8x128xf32, #tpu.memory_space<vmem>>, vector<8x128xf32>
      tpu.vector_store %arg10[%c0_21, %c0_22], %28 {strides = array<i32>} : memref<8x128xf32, #tpu.memory_space<vmem>>, vector<8x128xf32>,
      %c0_23 = arith.constant 0 : index
      %c0_24 = arith.constant 0 : index
      %30 = vector.load %arg7[%c0_23, %c0_24] : memref<128x128xbf16, #tpu.memory_space<vmem>>, vector<128x128xbf16>
      %cst_25 = arith.constant dense<0.000000e+00> : vector<8x128xf32>
      %31 = tpu.matmul %22, %30, %cst_25 {dimension_numbers = #tpu.dot_dimension_numbers<[1], [0], [0], [1], [0, 0, 1, 1], [], []>} : vector<8x128xbf16>, vector<128x128xbf16>, vector<8x128xf32> -> vector<8x128xf32>
      %c0_26 = arith.constant 0 : index
      %c0_27 = arith.constant 0 : index
      %32 = vector.load %arg8[%c0_26, %c0_27] : memref<128x128xbf16, #tpu.memory_space<vmem>>, vector<128x128xbf16>
      %cst_28 = arith.constant dense<0.000000e+00> : vector<8x128xf32>
      %33 = tpu.matmul %25, %32, %cst_28 {dimension_numbers = #tpu.dot_dimension_numbers<[1], [0], [0], [1], [0, 0, 1, 1], [], []>} : vector<8x128xbf16>, vector<128x128xbf16>, vector<8x128xf32> -> vector<8x128xf32>
      %34 = arith.subf %31, %33 : vector<8x128xf32>
      %c0_29 = arith.constant 0 : index
      %c0_30 = arith.constant 0 : index
      %35 = vector.load %arg9[%c0_29, %c0_30] : memref<8x128xf32, #tpu.memory_space<vmem>>, vector<8x128xf32>
      tpu.vector_store %arg9[%c0_29, %c0_30], %34 {strides = array<i32>} : memref<8x128xf32, #tpu.memory_space<vmem>>, vector<8x128xf32>,
    } else {
    }
    return
  }
  func.func @transform_0(%arg0: i32, %arg1: i32) -> (i32, i32, i32) {
    %c0_i32 = arith.constant 0 : i32
    %c0_i32_0 = arith.constant 0 : i32
    return %arg0, %arg1, %c0_i32 : i32, i32, i32
  }
  func.func @transform_1(%arg0: i32, %arg1: i32) -> (i32, i32, i32) {
    %c0_i32 = arith.constant 0 : i32
    %c0_i32_0 = arith.constant 0 : i32
    return %arg1, %arg0, %c0_i32 : i32, i32, i32
  }
  func.func @transform_2(%arg0: i32, %arg1: i32) -> (i32, i32) {
    %c0_i32 = arith.constant 0 : i32
    %c0_i32_0 = arith.constant 0 : i32
    return %arg0, %c0_i32 : i32, i32
  }
  func.func @transform_3(%arg0: i32, %arg1: i32) -> (i32, i32) {
    %c0_i32 = arith.constant 0 : i32
    %c0_i32_0 = arith.constant 0 : i32
    %c0_i32_1 = arith.constant 0 : i32
    return %c0_i32, %c0_i32_0 : i32, i32
  }
  func.func @transform_4(%arg0: i32, %arg1: i32) -> (i32, i32) {
    %c0_i32 = arith.constant 0 : i32
    %c0_i32_0 = arith.constant 0 : i32
    %c0_i32_1 = arith.constant 0 : i32
    return %c0_i32, %c0_i32_0 : i32, i32
  }
  func.func @transform_5(%arg0: i32, %arg1: i32) -> (i32, i32) {
    %c0_i32 = arith.constant 0 : i32
    %c0_i32_0 = arith.constant 0 : i32
    %c0_i32_1 = arith.constant 0 : i32
    return %c0_i32, %c0_i32_0 : i32, i32
  }
  func.func @transform_6(%arg0: i32, %arg1: i32) -> (i32, i32) {
    %c0_i32 = arith.constant 0 : i32
    %c0_i32_0 = arith.constant 0 : i32
    %c0_i32_1 = arith.constant 0 : i32
    return %c0_i32, %c0_i32_0 : i32, i32
  }
  func.func @transform_7(%arg0: i32, %arg1: i32) -> (i32, i32) {
    %c0_i32 = arith.constant 0 : i32
    %c0_i32_0 = arith.constant 0 : i32
    return %arg0, %c0_i32 : i32, i32
  }
  func.func @transform_8(%arg0: i32, %arg1: i32) -> (i32, i32) {
    %c0_i32 = arith.constant 0 : i32
    %c0_i32_0 = arith.constant 0 : i32
    return %arg0, %c0_i32 : i32, i32
  }
}

module attributes {stable_mosaic.version = 11 : i64} {
  func.func @sentdebias_kernel(%arg0: i32, %arg1: i32, %arg2: memref<8x16x128xbf16, #tpu.memory_space<vmem>>, %arg3: memref<1x8x16xf32, #tpu.memory_space<vmem>>, %arg4: memref<8x1xf32, #tpu.memory_space<vmem>>, %arg5: memref<128x128xbf16, #tpu.memory_space<vmem>>, %arg6: memref<128x128xbf16, #tpu.memory_space<vmem>>, %arg7: memref<128x128xbf16, #tpu.memory_space<vmem>>, %arg8: memref<128x128xbf16, #tpu.memory_space<vmem>>, %arg9: memref<8x128xf32, #tpu.memory_space<vmem>>, %arg10: memref<8x128xf32, #tpu.memory_space<vmem>>, %arg11: memref<8x128xf32, #tpu.memory_space<vmem>>) attributes {dimension_semantics = [#tpu.dimension_semantics<parallel>, #tpu.dimension_semantics<arbitrary>], iteration_bounds = array<i64: 2, 2>, scalar_prefetch = 0 : i64, scratch_operands = 1 : i64, tpu.core_type = #tpu.core_type<tc>, window_params = [{transform_indices = @transform_0, window_bounds = array<i64: 8, 16, 128>}, {transform_indices = @transform_1, window_bounds = array<i64: 1, 8, 16>}, {transform_indices = @transform_2, window_bounds = array<i64: 8, 1>}, {pipeline_mode = #tpu.pipeline_mode<synchronous>, transform_indices = @transform_3, window_bounds = array<i64: 128, 128>}, {pipeline_mode = #tpu.pipeline_mode<synchronous>, transform_indices = @transform_4, window_bounds = array<i64: 128, 128>}, {pipeline_mode = #tpu.pipeline_mode<synchronous>, transform_indices = @transform_5, window_bounds = array<i64: 128, 128>}, {pipeline_mode = #tpu.pipeline_mode<synchronous>, transform_indices = @transform_6, window_bounds = array<i64: 128, 128>}, {transform_indices = @transform_7, window_bounds = array<i64: 8, 128>}, {transform_indices = @transform_8, window_bounds = array<i64: 8, 128>}]} {
    %c0_i32 = arith.constant 0 : i32
    %0 = arith.cmpi eq, %arg1, %c0_i32 : i32
    %1 = arith.extui %0 : i1 to i32
    %c0_i32_0 = arith.constant 0 : i32
    %2 = arith.cmpi ne, %1, %c0_i32_0 : i32
    scf.if %2 {
      %cst_11 = arith.constant 0.000000e+00 : f32
      %18 = vector.broadcast %cst_11 : f32 to vector<8x128xf32>
      %c0_12 = arith.constant 0 : index
      %c0_13 = arith.constant 0 : index
      %19 = vector.load %arg11[%c0_12, %c0_13] : memref<8x128xf32, #tpu.memory_space<vmem>>, vector<8x128xf32>
      tpu.vector_store %arg11[%c0_12, %c0_13], %18 {strides = array<i32>} : memref<8x128xf32, #tpu.memory_space<vmem>>, vector<8x128xf32>,
    } else {
    }
    %c0 = arith.constant 0 : index
    %c0_1 = arith.constant 0 : index
    %c0_2 = arith.constant 0 : index
    %3 = vector.load %arg3[%c0, %c0_1, %c0_2] : memref<1x8x16xf32, #tpu.memory_space<vmem>>, vector<1x8x16xf32>
    %4 = vector.shape_cast %3 : vector<1x8x16xf32> to vector<8x16xf32>
    %5 = arith.truncf %4 : vector<8x16xf32> to vector<8x16xbf16>
    %c0_3 = arith.constant 0 : index
    %c0_4 = arith.constant 0 : index
    %6 = vector.load %arg11[%c0_3, %c0_4] : memref<8x128xf32, #tpu.memory_space<vmem>>, vector<8x128xf32>
    %c0_5 = arith.constant 0 : index
    %c0_6 = arith.constant 0 : index
    %c0_7 = arith.constant 0 : index
    %7 = vector.load %arg2[%c0_5, %c0_6, %c0_7] : memref<8x16x128xbf16, #tpu.memory_space<vmem>>, vector<8x16x128xbf16>
    %8 = vector.shape_cast %5 : vector<8x16xbf16> to vector<8x16x1xbf16>
    %9 = vector.broadcast %8 : vector<8x16x1xbf16> to vector<8x16x128xbf16>
    %10 = arith.mulf %7, %9 : vector<8x16x128xbf16>
    %11 = arith.extf %10 : vector<8x16x128xbf16> to vector<8x16x128xf32>
    %cst = arith.constant dense<0.000000e+00> : vector<8x128xf32>
    %12 = vector.multi_reduction <add>, %11, %cst [1] : vector<8x16x128xf32> to vector<8x128xf32>
    %13 = arith.addf %6, %12 : vector<8x128xf32>
    %c0_8 = arith.constant 0 : index
    %c0_9 = arith.constant 0 : index
    %14 = vector.load %arg11[%c0_8, %c0_9] : memref<8x128xf32, #tpu.memory_space<vmem>>, vector<8x128xf32>
    tpu.vector_store %arg11[%c0_8, %c0_9], %13 {strides = array<i32>} : memref<8x128xf32, #tpu.memory_space<vmem>>, vector<8x128xf32>,
    %c1_i32 = arith.constant 1 : i32
    %15 = arith.cmpi eq, %arg1, %c1_i32 : i32
    %16 = arith.extui %15 : i1 to i32
    %c0_i32_10 = arith.constant 0 : i32
    %17 = arith.cmpi ne, %16, %c0_i32_10 : i32
    scf.if %17 {
      %c0_11 = arith.constant 0 : index
      %c0_12 = arith.constant 0 : index
      %18 = vector.load %arg11[%c0_11, %c0_12] : memref<8x128xf32, #tpu.memory_space<vmem>>, vector<8x128xf32>
      %c0_13 = arith.constant 0 : index
      %c0_14 = arith.constant 0 : index
      %19 = vector.load %arg4[%c0_13, %c0_14] : memref<8x1xf32, #tpu.memory_space<vmem>>, vector<8x1xf32>
      %20 = vector.broadcast %19 : vector<8x1xf32> to vector<8x128xf32>
      %21 = arith.mulf %18, %20 : vector<8x128xf32>
      %22 = arith.truncf %21 : vector<8x128xf32> to vector<8x128xbf16>
      %c0_15 = arith.constant 0 : index
      %c0_16 = arith.constant 0 : index
      %23 = vector.load %arg5[%c0_15, %c0_16] : memref<128x128xbf16, #tpu.memory_space<vmem>>, vector<128x128xbf16>
      %cst_17 = arith.constant dense<0.000000e+00> : vector<8x128xf32>
      %24 = tpu.matmul %22, %23, %cst_17 {dimension_numbers = #tpu.dot_dimension_numbers<[1], [0], [0], [1], [0, 0, 1, 1], [], []>} : vector<8x128xbf16>, vector<128x128xbf16>, vector<8x128xf32> -> vector<8x128xf32>
      %25 = arith.truncf %24 : vector<8x128xf32> to vector<8x128xbf16>
      %c0_18 = arith.constant 0 : index
      %c0_19 = arith.constant 0 : index
      %26 = vector.load %arg6[%c0_18, %c0_19] : memref<128x128xbf16, #tpu.memory_space<vmem>>, vector<128x128xbf16>
      %cst_20 = arith.constant dense<0.000000e+00> : vector<8x128xf32>
      %27 = tpu.matmul %25, %26, %cst_20 {dimension_numbers = #tpu.dot_dimension_numbers<[1], [0], [0], [1], [0, 0, 1, 1], [], []>} : vector<8x128xbf16>, vector<128x128xbf16>, vector<8x128xf32> -> vector<8x128xf32>
      %28 = arith.subf %21, %27 : vector<8x128xf32>
      %c0_21 = arith.constant 0 : index
      %c0_22 = arith.constant 0 : index
      %29 = vector.load %arg10[%c0_21, %c0_22] : memref<8x128xf32, #tpu.memory_space<vmem>>, vector<8x128xf32>
      tpu.vector_store %arg10[%c0_21, %c0_22], %28 {strides = array<i32>} : memref<8x128xf32, #tpu.memory_space<vmem>>, vector<8x128xf32>,
      %c0_23 = arith.constant 0 : index
      %c0_24 = arith.constant 0 : index
      %30 = vector.load %arg7[%c0_23, %c0_24] : memref<128x128xbf16, #tpu.memory_space<vmem>>, vector<128x128xbf16>
      %cst_25 = arith.constant dense<0.000000e+00> : vector<8x128xf32>
      %31 = tpu.matmul %22, %30, %cst_25 {dimension_numbers = #tpu.dot_dimension_numbers<[1], [0], [0], [1], [0, 0, 1, 1], [], []>} : vector<8x128xbf16>, vector<128x128xbf16>, vector<8x128xf32> -> vector<8x128xf32>
      %c0_26 = arith.constant 0 : index
      %c0_27 = arith.constant 0 : index
      %32 = vector.load %arg8[%c0_26, %c0_27] : memref<128x128xbf16, #tpu.memory_space<vmem>>, vector<128x128xbf16>
      %cst_28 = arith.constant dense<0.000000e+00> : vector<8x128xf32>
      %33 = tpu.matmul %25, %32, %cst_28 {dimension_numbers = #tpu.dot_dimension_numbers<[1], [0], [0], [1], [0, 0, 1, 1], [], []>} : vector<8x128xbf16>, vector<128x128xbf16>, vector<8x128xf32> -> vector<8x128xf32>
      %34 = arith.subf %31, %33 : vector<8x128xf32>
      %c0_29 = arith.constant 0 : index
      %c0_30 = arith.constant 0 : index
      %35 = vector.load %arg9[%c0_29, %c0_30] : memref<8x128xf32, #tpu.memory_space<vmem>>, vector<8x128xf32>
      tpu.vector_store %arg9[%c0_29, %c0_30], %34 {strides = array<i32>} : memref<8x128xf32, #tpu.memory_space<vmem>>, vector<8x128xf32>,
    } else {
    }
    return
  }
  func.func @transform_0(%arg0: i32, %arg1: i32) -> (i32, i32, i32) {
    %c0_i32 = arith.constant 0 : i32
    %c0_i32_0 = arith.constant 0 : i32
    return %arg0, %arg1, %c0_i32 : i32, i32, i32
  }
  func.func @transform_1(%arg0: i32, %arg1: i32) -> (i32, i32, i32) {
    %c0_i32 = arith.constant 0 : i32
    %c0_i32_0 = arith.constant 0 : i32
    return %arg1, %arg0, %c0_i32 : i32, i32, i32
  }
  func.func @transform_2(%arg0: i32, %arg1: i32) -> (i32, i32) {
    %c0_i32 = arith.constant 0 : i32
    %c0_i32_0 = arith.constant 0 : i32
    return %arg0, %c0_i32 : i32, i32
  }
  func.func @transform_3(%arg0: i32, %arg1: i32) -> (i32, i32) {
    %c0_i32 = arith.constant 0 : i32
    %c0_i32_0 = arith.constant 0 : i32
    %c0_i32_1 = arith.constant 0 : i32
    return %c0_i32, %c0_i32_0 : i32, i32
  }
  func.func @transform_4(%arg0: i32, %arg1: i32) -> (i32, i32) {
    %c0_i32 = arith.constant 0 : i32
    %c0_i32_0 = arith.constant 0 : i32
    %c0_i32_1 = arith.constant 0 : i32
    return %c0_i32, %c0_i32_0 : i32, i32
  }
  func.func @transform_5(%arg0: i32, %arg1: i32) -> (i32, i32) {
    %c0_i32 = arith.constant 0 : i32
    %c0_i32_0 = arith.constant 0 : i32
    %c0_i32_1 = arith.constant 0 : i32
    return %c0_i32, %c0_i32_0 : i32, i32
  }
  func.func @transform_6(%arg0: i32, %arg1: i32) -> (i32, i32) {
    %c0_i32 = arith.constant 0 : i32
    %c0_i32_0 = arith.constant 0 : i32
    %c0_i32_1 = arith.constant 0 : i32
    return %c0_i32, %c0_i32_0 : i32, i32
  }
  func.func @transform_7(%arg0: i32, %arg1: i32) -> (i32, i32) {
    %c0_i32 = arith.constant 0 : i32
    %c0_i32_0 = arith.constant 0 : i32
    return %arg0, %c0_i32 : i32, i32
  }
  func.func @transform_8(%arg0: i32, %arg1: i32) -> (i32, i32) {
    %c0_i32 = arith.constant 0 : i32
    %c0_i32_0 = arith.constant 0 : i32
    return %arg0, %c0_i32 : i32, i32
  }
}

</mosaic_0001>

<bundles_post_ra>
// kernel: tpu_custom_call.1
= control target key start
LH: loop header
LB: loop body
LE: loop exit
PB: predicated region body
PF: predicated region fallthrough
CT: control target
= control target key end

     0   :  { %s2731_s0 = inlined_call_operand.hbm [shape: bf16[16,32,128], index: 0, kind: input, shape index: {}]   ;;  %s2732_s1 = inlined_call_operand.hbm [shape: f32[2,16,16], index: 1, kind: input, shape index: {}]   ;;  %s2733_s2 = inlined_call_operand.vmem [shape: f32[16,1], index: 2, kind: input, shape index: {}]   ;;  %s2734_s3 = inlined_call_operand.hbm [shape: bf16[128,128], index: 3, kind: input, shape index: {}]   ;;  %s2735_s4 = inlined_call_operand.hbm [shape: bf16[128,128], index: 4, kind: input, shape index: {}]   ;;  %s2736_s5 = inlined_call_operand.hbm [shape: bf16[128,128], index: 5, kind: input, shape index: {}]   ;;  %s2737_s6 = inlined_call_operand.hbm [shape: bf16[128,128], index: 6, kind: input, shape index: {}]   ;;  %s2738_s7 = inlined_call_operand.hbm [shape: f32[16,128], index: 7, kind: output, shape index: {0}]   ;;  %s2739_s8 = inlined_call_operand.hbm [shape: f32[16,128], index: 8, kind: output, shape index: {1}]  }
   0x1   :  { %2761 = sst [smem:[#allocation40_spill]] %s2733_s2 }
   0x2   :  { %2762 = sst [smem:[#allocation41_spill]] %s2738_s7 }
   0x3   :  { %2763 = sst [smem:[#allocation42_spill]] %s2739_s8 }
   0x4   :  { %14 = vsyncpa [#allocation4], 0 }
   0x5   :  { %16 = vsyncpa [#allocation4 + $0x1], 0 }
   0x6   :  { %17 = vsyncpa [#allocation7], 0 }
   0x7   :  { %19 = vsyncpa [#allocation7 + $0x1], 0 }
   0x8   :  { %20 = vsyncpa [#allocation10], 0 }
   0x9   :  { %21 = vsyncpa [#allocation13], 0 }
   0xa   :  { %22 = vsyncpa [#allocation5], 0 }
   0xb   :  { %24 = vsyncpa [#allocation5 + $0x1], 0 }
   0xc   :  { %25 = vsyncpa [#allocation16], 0 }
   0xd   :  { %27 = vsyncpa [#allocation16 + $0x1], 0  ;;  %s2250_s27 = smov 0   ;;  %s2252_s28 = smov 0  }
   0xe   :  { %s2254_s29 = smov 0   ;;  %s2256_s30 = smov 0  }
   0xf   :  { %s2258_s9 = smov 0   ;;  %s2260_s10 = smov 0  }
  0x10   :  { %s2262_s11 = smov 0   ;;  %s2264_s12 = smov 0  }
  0x11   :  { %s2266_s13 = smov 0   ;;  %s2268_s14 = smov 0  }
  0x12   :  { %s2270_s15 = smov 0  }
  0x13 LB: > { %2764 = sst [smem:[#allocation27_spill]] %s2142_s27  ;;  %s2304_s16 = sadd.s32 4294967295, %s2182_s15   ;;  %s2182_s15 = sphi %s2270_s15, %s33_s15   ;;  %s2178_s14 = sphi %s2268_s14, %s2820_s14   ;;  %s2174_s13 = sphi %s2266_s13, %s2819_s13   ;;  %s2170_s12 = sphi %s2264_s12, %s2818_s12   ;;  %s2166_s11 = sphi %s2262_s11, %s2817_s11   ;;  %s2162_s10 = sphi %s2260_s10, %s2816_s10   ;;  %s2158_s9 = sphi %s2258_s9, %s2815_s9   ;;  %s2154_s30 = sphi %s2256_s30, %s2814_s30   ;;  %s2150_s29 = sphi %s2254_s29, %s2810_s29   ;;  %s2146_s28 = sphi %s2252_s28, %s2809_s28   ;;  %s2142_s27 = sphi %s2250_s27, %s2808_s27  }
  0x14   : > { %2765 = sst [smem:[#allocation28_spill]] %s2146_s28  ;;  %s1489_s17 = sadd.s32 4294967294, %s2182_s15  }
  0x15   : > { %2766 = sst [smem:[#allocation29_spill]] %s2150_s29  ;;  %s42_s18 = sadd.s32 1, %s2174_s13 }
  0x16   : > { %2767 = sst [smem:[#allocation30_spill]] %s2166_s11  ;;  %s45_s19 = sadd.s32 1, %s2178_s14 }
  0x17   : > { %2768 = sst [smem:[#allocation31_spill]] %s2170_s12  ;;  %p43_p0 = scmp.ge.s32.totalorder %s42_s18, 2 }
  0x18   : > { %2769 = sst [smem:[#allocation32_spill]] %s2304_s16  ;;  %s54_s20 = sadd.s32 1, %s2162_s10 }
  0x19   : > { %p61_p1 = scmp.ne.s32.totalorder %s2162_s10, %s2158_s9  ;;  %p62_p2 = scmp.eq.s32.totalorder %s2182_s15, 0 }
  0x1a   : > { %s2822_s18 = smov (%p43_p0, %s42_s18), 0  ;;  %s2824_s19 = smov (!%p43_p0, %s45_s19), %s2178_s14 }
  0x1b   : > { %2770 = sst [smem:[#allocation33_spill]] %s2822_s18  ;;  %s50_s21 = ssub.s32 %s2174_s13, %s2822_s18 }
  0x1c   : > { %p2318_p3 = por %p62_p2, %p61_p1  ;;  %p47_p4 = scmp.ge.s32.totalorder %s2824_s19, 2 }
  0x1d   : > { %p67_p5 = scmp.ne.s32.totalorder %s2158_s9, %s2154_s30  ;;  %p2746_p6 = scmp.eq.s32.totalorder %s2304_s16, 0 }
  0x1e   : > { %s2771_s22 = scalar_select %p2318_p3, 1, 0 }
  0x1f   : > { %s218_s23 = sadd.s32 1, %s2150_s29  ;;  %s2826_s19 = smov (%p47_p4, %s2824_s19), 0 }
  0x20   : > { %2772 = sst [smem:[#allocation34_spill]] %s2826_s19  ;;  %p2329_p7 = por %p2746_p6, %p67_p5 }
  0x21   : > { %p228_p8 = scmp.ne.s32.totalorder %s2150_s29, %s2146_s28  ;;  %s49_s25 = ssub.s32 %s2178_s14, %s2826_s19 }
  0x22   : > { %s2773_s24 = scalar_select %p2329_p7, 1, 0 }
  0x23   : > { %p229_p9 = scmp.eq.s32.totalorder %s2304_s16, 3  ;;  %s51_s26 = sor.u32 %s50_s21, %s49_s25 }
  0x24   : > { %2774 = sst [smem:[#allocation35_spill]] %s2773_s24  ;;  %p216_p10 = scmp.eq.s32.totalorder %s49_s25, 0 }
  0x25   : > { %p52_p11 = scmp.eq.s32.totalorder %s51_s26, 0  ;;  %p2338_p12 = por %p229_p9, %p228_p8 }
  0x26   : > { %s2343_s18 = scalar_select %p216_p10, %s2150_s29, %s218_s23  }
  0x27   : > { %s2775_s30 = scalar_select %p2338_p12, 1, 0 }
  0x28   : > { %2777 = sst [smem:[#allocation37_spill]] %s2343_s18  ;;  %p234_p13 = scmp.ne.s32.totalorder %s2146_s28, %s2142_s27 }
  0x29   : > { %2776 = sst [smem:[#allocation36_spill]] %s2775_s30  ;;  %p235_p0 = scmp.eq.s32.totalorder %s1489_s17, 3 }
  0x2a   : > { %s2346_s8 = scalar_select %p52_p11, %s2162_s10, %s54_s20  }
  0x2b   : > { %p1490_p1 = scmp.ge.s32.totalorder %s2182_s15, 1  ;;  %p268_p2 = scmp.lt.s32.totalorder %s2182_s15, 5 }
  0x2c   : > { %2778 = sst [smem:[#allocation38_spill]] %s2346_s8  ;;  %p2352_p4 = por %p235_p0, %p234_p13 }
  0x2d   : > { %p2356_p5 = pnand %p1490_p1, %p268_p2  ;;  %s2184_s25 = smov [#allocation9]  }
  0x2e   : > { %s2779_s7 = scalar_select %p2352_p4, 1, 0 }
  0x2f   : > { %s2781_s21 = scalar_select %p2356_p5, 1, 0 }
  0x30   : > { %2780 = sst [smem:[#allocation39_spill]] %s2779_s7  ;;  %p1704_p8 = pneg %p2356_p5 }
  0x31   : > { %s293_s23 = sshll.u32 %s2184_s25, 4  ;;  %s1872_s19 = scalar_lea.hbm %s2735_s4, 1024  ;;  %s294_s23 = int_to_ptr.vmem [resolvable:$true] %s293_s23 }
  0x32   : > { %p2364_p9 = pnand %p1704_p8, %p2746_p6  ;;  %p1873_p10 = scmp.ne.s32.totalorder %s2735_s4, %s1872_s19 }
  0x33   : > { %p1879_p1 = scmp.lt.u32.totalorder %s1872_s19, %s2735_s4 }
  0x34   : > { %p2376_p11 = pneg %p2364_p9 }
  0x36   : > { %p1875_p13 = pnand %p2376_p11, %p1873_p10 }
  0x38   : > { %p1876_p0 = pneg %p1875_p13 }
  0x3a   : > { %p1881_p2 = pnand %p1879_p1, %p1876_p0 }
  0x3c   : > { %1884 = shalt.err (!%p1881_p2)
}
  0x3d   : > { %s1885_s17 = scalar_lea.vmem %s294_s23, 1024  ;;  %p1893_p12 = scmp.lt.s32.totalorder %s294_s23, %s294_s23 }
  0x3e   : > { %p1886_p8 = scmp.ne.s32.totalorder %s294_s23, %s1885_s17  ;;  %p1894_p7 = scmp.lt.s32.totalorder %s1885_s17, %s1885_s17 }
  0x40   : > { %p1888_p6 = pnand %p1886_p8, %p2376_p11  ;;  %p1895_p5 = por %p1894_p7, %p1893_p12 }
  0x42   : > { %p1889_p4 = pneg %p1888_p6 }
  0x44   : > { %p1896_p3 = pnand %p1895_p5, %p1889_p4 }
  0x46   : > { %1899 = shalt.err (!%p1896_p3)
}
  0x47   : > { %s2185_s8 = smov 64   ;;  %s2186_s18 = smov 4  }
  0x48   : > { %1710 = dma.hbm_to_vmem [thread:$0]  (!%p2364_p9), %s2735_s4, 1024, %s294_s23, [#allocation10], %s2185_s8, %s2185_s8, %s2186_s18  }
  0x49   : > { %s2187_s26 = smov [#allocation8]   ;;  %s2188_s27 = smov [#allocation11]  }
  0x4a   : > { %s280_s25 = sshll.u32 %s2187_s26, 4  ;;  %s306_s17 = sshll.u32 %s2188_s27, 4  ;;  %s281_s25 = int_to_ptr.vmem [resolvable:$true] %s280_s25  ;;  %s307_s17 = int_to_ptr.vmem [resolvable:$true] %s306_s17 }
  0x4b   : > { %s1900_s2 = scalar_lea.hbm %s2734_s3, 1024 }
  0x4c   : > { %p1901_p3 = scmp.ne.s32.totalorder %s2734_s3, %s1900_s2  ;;  %p1907_p12 = scmp.lt.u32.totalorder %s1900_s2, %s2734_s3 }
  0x4e   : > { %p1903_p6 = pnand %p1901_p3, %p2376_p11 }
  0x50   : > { %p1904_p7 = pneg %p1903_p6 }
  0x52   : > { %p1909_p4 = pnand %p1907_p12, %p1904_p7 }
  0x54   : > { %1912 = shalt.err (!%p1909_p4)
}
  0x55   : > { %s1913_s23 = scalar_lea.vmem %s281_s25, 1024  ;;  %p1921_p0 = scmp.lt.s32.totalorder %s281_s25, %s281_s25 }
  0x56   : > { %p1914_p5 = scmp.ne.s32.totalorder %s281_s25, %s1913_s23  ;;  %p1922_p1 = scmp.lt.s32.totalorder %s1913_s23, %s1913_s23 }
  0x58   : > { %p1916_p10 = pnand %p1914_p5, %p2376_p11  ;;  %p1923_p2 = por %p1922_p1, %p1921_p0 }
  0x5a   : > { %p1917_p13 = pneg %p1916_p10 }
  0x5c   : > { %p1924_p8 = pnand %p1923_p2, %p1917_p13 }
  0x5e   : > { %1927 = shalt.err (!%p1924_p8)
}
  0x5f   : > { %1707 = dma.hbm_to_vmem [thread:$0]  (!%p2364_p9), %s2734_s3, 1024, %s281_s25, [#allocation7], %s2185_s8, %s2185_s8, %s2186_s18  }
  0x60   : > { %s1928_s12 = scalar_lea.hbm %s2736_s5, 1024 }
  0x61   : > { %p1929_p3 = scmp.ne.s32.totalorder %s2736_s5, %s1928_s12  ;;  %p1935_p12 = scmp.lt.u32.totalorder %s1928_s12, %s2736_s5 }
  0x63   : > { %p1931_p6 = pnand %p1929_p3, %p2376_p11 }
  0x65   : > { %p1932_p7 = pneg %p1931_p6 }
  0x67   : > { %p1937_p4 = pnand %p1935_p12, %p1932_p7 }
  0x69   : > { %1940 = shalt.err (!%p1937_p4)
}
  0x6a   : > { %s1941_s19 = scalar_lea.vmem %s307_s17, 1024  ;;  %p1949_p0 = scmp.lt.s32.totalorder %s307_s17, %s307_s17 }
  0x6b   : > { %p1942_p5 = scmp.ne.s32.totalorder %s307_s17, %s1941_s19  ;;  %p1950_p1 = scmp.lt.s32.totalorder %s1941_s19, %s1941_s19 }
  0x6d   : > { %p1944_p10 = pnand %p1942_p5, %p2376_p11  ;;  %p1951_p2 = por %p1950_p1, %p1949_p0 }
  0x6f   : > { %p1945_p13 = pneg %p1944_p10 }
  0x71   : > { %p1952_p8 = pnand %p1951_p2, %p1945_p13 }
  0x73   : > { %1955 = shalt.err (!%p1952_p8)
}
  0x74   : > { %1713 = dma.hbm_to_vmem [thread:$0]  (!%p2364_p9), %s2736_s5, 1024, %s307_s17, [#allocation10], %s2185_s8, %s2185_s8, %s2186_s18  }
  0x75   : > { %s2189_s23 = smov [#allocation12]   ;;  %s1956_s11 = scalar_lea.hbm %s2737_s6, 1024 }
  0x76   : > { %s319_s27 = sshll.u32 %s2189_s23, 4  ;;  %p1957_p3 = scmp.ne.s32.totalorder %s2737_s6, %s1956_s11  ;;  %s320_s27 = int_to_ptr.vmem [resolvable:$true] %s319_s27 }
  0x77   : > { %p1963_p12 = scmp.lt.u32.totalorder %s1956_s11, %s2737_s6 }
  0x78   : > { %p1959_p6 = pnand %p1957_p3, %p2376_p11 }
  0x7a   : > { %p1960_p7 = pneg %p1959_p6 }
  0x7c   : > { %p1965_p4 = pnand %p1963_p12, %p1960_p7 }
  0x7e   : > { %1968 = shalt.err (!%p1965_p4)
}
  0x7f   : > { %s1969_s17 = scalar_lea.vmem %s320_s27, 1024  ;;  %p1977_p0 = scmp.lt.s32.totalorder %s320_s27, %s320_s27 }
  0x80   : > { %p1970_p5 = scmp.ne.s32.totalorder %s320_s27, %s1969_s17  ;;  %p1978_p1 = scmp.lt.s32.totalorder %s1969_s17, %s1969_s17 }
  0x82   : > { %p1972_p10 = pnand %p1970_p5, %p2376_p11  ;;  %p1979_p2 = por %p1978_p1, %p1977_p0 }
  0x84   : > { %p1973_p13 = pneg %p1972_p10 }
  0x86   : > { %p1980_p8 = pnand %p1979_p2, %p1973_p13 }
  0x88   : > { %1983 = shalt.err (!%p1980_p8)
}
  0x89   : > { %1716 = dma.hbm_to_vmem [thread:$0]  (!%p2364_p9), %s2737_s6, 1024, %s320_s27, [#allocation13], %s2185_s8, %s2185_s8, %s2186_s18  }
  0x8a   : > { %p1495_p3 = scmp.ge.s32.totalorder %s2182_s15, 4 }
  0x8c   : > { %329 = sbr.rel (%p1495_p3) target bundleno = 188 (0xbc), region = 32 }
  0x93   : > { %s2460_s29 = sand.u32 1, %s2162_s10   ;;  %s1498_s20 = sshll.u32 %s2174_s13, 1 }
  0x94   : > { %s1496_s26 = sshll.u32 %s2460_s29, 6  ;;  %s1556_s25 = sshll.u32 %s2178_s14, 5 }
  0x95   : > { %s344_s8 = sadd.s32 %s1556_s25, %s1498_s20  ;;  %s337_s18 = scalar_lea.vmem [#allocation3], %s1496_s26 }
  0x96   : > { %s359_s23 = sshll.u32 %s337_s18, 4  ;;  %s1500_s27 = sshll.u32 %s344_s8, 6  ;;  %s360_s23 = int_to_ptr.vmem [resolvable:$true] %s359_s23 }
  0x97   : > { %p2784_p9 = scmp.ne.s32.totalorder %s2771_s22, 0  ;;  %s2190_s28 = smov 256  }
  0x98   : > { %s2191_s12 = smov 128   ;;  %s2192_s16 = smov 2  }
  0x99   : > { %s1681_s2 = scalar_select %p2784_p9, [#allocation0], [#allocation19] }
  0x9a   : > { %1682 = sst [smem:[#allocation18]] (%p2784_p9), %s2190_s28  ;;  %s2193_s24 = smov 64  }
  0x9b   : > { %s351_s11 = sld [smem:[%s1681_s2]]   ;;  %s346_s7 = scalar_lea.hbm %s2731_s0, %s1500_s27 }
  0x9c   : > { %1683 = sst [smem:[#allocation18 + $0x1]] (%p2784_p9), %s2191_s12  ;;  %s2194_s19 = smov 4  }
  0x9d   : > { %1684 = sst [smem:[#allocation18 + $0x2]] (%p2784_p9), %s2192_s16  ;;  %s334_s8 = scalar_lea.sflag [#allocation4], %s2460_s29 }
  0x9e   : > { %1685 = sst [smem:[#allocation18 + $0x3]] (%p2784_p9), %s2193_s24  ;;  %s2195_s18 = smov [#allocation17]  }
  0x9f   : > { %1686 = sst [smem:[#allocation18 + $0x4]] (%p2784_p9), %s2193_s24  ;;  %s382_s2 = sand.u32 1, %s2182_s15  }
  0xa0   : > { %1687 = sst [smem:[#allocation18 + $0x5]] (%p2784_p9), %s2194_s19  ;;  %s1503_s28 = sshll.u32 %s2460_s29, 3 }
  0xa1   : > { %s1501_s26 = sshll.u32 %s351_s11, 26  ;;  %s391_s27 = sadd.s32 %s2178_s14, %s1498_s20 }
  0xa2   : > { %s1502_s25 = sadd.s32 134217728, %s1501_s26  ;;  %s386_s12 = scalar_lea.vmem [#allocation6], %s1503_s28 }
  0xa3   : > { %1688 = dma.general (%p2784_p9), %s346_s7, 1024, %s360_s23, %s334_s8, %s2195_s18, [#allocation18], %s1502_s25, 0  }
  0xa4   : > { %s395_s16 = sshll.u32 %s386_s12, 4  ;;  %s1505_s24 = sshll.u32 %s391_s27, 7  ;;  %s2492_s16 = int_to_ptr.vmem [resolvable:$true] %s395_s16 }
  0xa5   : > { %s393_s17 = scalar_lea.hbm %s2732_s1, %s1505_s24  ;;  %s383_s19 = scalar_lea.sflag [#allocation7], %s382_s2 }
  0xa6   : > { %s1984_s23 = scalar_lea.hbm %s393_s17, 128  ;;  %s1988_s29 = scalar_lea.hbm %s2732_s1, 512 }
  0xa7   : > { %p1985_p11 = scmp.ne.s32.totalorder %s393_s17, %s1984_s23  ;;  %p1989_p12 = scmp.lt.u32.totalorder %s393_s17, %s2732_s1 }
  0xa8   : > { %p1990_p4 = scmp.lt.u32.totalorder %s1988_s29, %s1984_s23  ;;  %p1992_p10 = scmp.lt.u32.totalorder %s1984_s23, %s393_s17 }
  0xa9   : > { %p1986_p6 = pnand %p1985_p11, %p2784_p9 }
  0xaa   : > { %p1991_p5 = por %p1990_p4, %p1989_p12 }
  0xab   : > { %p1987_p7 = pneg %p1986_p6 }
  0xac   : > { %p1993_p13 = por %p1992_p10, %p1991_p5 }
  0xae   : > { %p1994_p0 = pnand %p1993_p13, %p1987_p7 }
  0xb0   : > { %1997 = shalt.err (!%p1994_p0)
}
  0xb1   : > { %s1998_s8 = scalar_lea.vmem %s2492_s16, 128  ;;  %s2196_s18 = smov [#allocation6]  }
  0xb2   : > { %p1999_p1 = scmp.ne.s32.totalorder %s2492_s16, %s1998_s8  ;;  %s2002_s2 = sshll.u32 %s2196_s18, 4  ;;  %s2003_s2 = int_to_ptr.vmem [resolvable:$false] %s2002_s2 }
  0xb3   : > { %s2004_s28 = scalar_lea.vmem %s2003_s2, 256  ;;  %p2005_p3 = scmp.lt.s32.totalorder %s2492_s16, %s2003_s2 }
  0xb4   : > { %p2000_p2 = pnand %p1999_p1, %p2784_p9  ;;  %p2006_p11 = scmp.lt.s32.totalorder %s2004_s28, %s1998_s8 }
  0xb6   : > { %p2001_p8 = pneg %p2000_p2  ;;  %p2007_p6 = por %p2006_p11, %p2005_p3 }
  0xb8   : > { %p2008_p12 = pnand %p2007_p6, %p2001_p8 }
  0xba   : > { %2011 = shalt.err (!%p2008_p12)
}
  0xbb   : > { %1689 = dma.hbm_to_vmem [thread:$0]  (%p2784_p9), %s393_s17, 128, %s2492_s16, %s383_s19  }
  0xbc PF: > { %p2785_p7 = scmp.ne.s32.totalorder %s2781_s21, 0 }
  0xbd   : > { %s2786_s27 = sld [smem:[#allocation35_spill]] (!%p2785_p7)  ;;  %s413_s12 = sand.u32 (!%p2785_p7), 1, %s2158_s9  }
  0xbe   : > { %411 = sbr.rel (%p2785_p7) target bundleno = 1028 (0x404), region = 48  ;;  %s1507_s24 = sshll.u32 (!%p2785_p7), %s413_s12, 6 }
  0xbf   : > { %s414_s11 = scalar_lea.sflag (!%p2785_p7), [#allocation4], %s413_s12  ;;  %s2516_s30 = scalar_lea.vmem (!%p2785_p7), [#allocation3], %s1507_s24 }
  0xc3   : > { %p2787_p4 = scmp.ne.s32.totalorder (!%p2785_p7), %s2786_s27, 0 }
  0xc5   : > { %2113 = dma.done.wait (%p2787_p4), %s414_s11, 1024  }
  0xc6   : > { %2115 = vsyncadd (%p2787_p4), %s414_s11, 4294966272  ;;  %s2788_s23 = sld [smem:[#allocation32_spill]]  ;;  %s1508_s16 = sshll.u32 %s413_s12, 3 }
  0xc7   : > { %s426_s19 = scalar_lea.vmem [#allocation6], %s1508_s16 }
  0xcc   : > { %s422_s22 = sand.u32 1, %s2788_s23  }
  0xcd   : > { %s423_s17 = scalar_lea.sflag [#allocation7], %s422_s22 }
  0xce   : > { %2117 = dma.done.wait (%p2787_p4), %s423_s17, 128  }
  0xcf   : > { %2119 = vsyncadd (%p2787_p4), %s423_s17, 4294967168  ;;  %p2789_p9 = scmp.eq.s32.totalorder %s2788_s23, 0 }
  0xd1   : > { %2121 = dma.done.wait (%p2789_p9), [#allocation7], 1024   ;;  %p2790_p5 = pmov %p2789_p9 }
  0xd3   : > { %2123 = vsyncadd (%p2790_p5), [#allocation7], 4294966272  ;;  %p2791_p10 = pmov %p2790_p5 }
  0xd4   : > { %p2792_p13 = pmov %p2790_p5 }
  0xd5   : > { %2125 = dma.done.wait (%p2791_p10), [#allocation10], 2048  }
  0xd6   : > { %2127 = vsyncadd (%p2792_p13), [#allocation10], 4294965248  ;;  %p2793_p0 = pmov %p2790_p5 }
  0xd8   : > { %2129 = dma.done.wait (%p2793_p0), [#allocation13], 1024   ;;  %p2794_p1 = pmov %p2793_p0 }
  0xd9   : > { %s2795_s21 = sld [smem:[#allocation28_spill]]  ;;  %s2797_s18 = sld [smem:[#allocation40_spill]] }
  0xda   : > { %2131 = vsyncadd (%p2794_p1), [#allocation13], 4294966272  ;;  %s2796_s7 = sld [smem:[#allocation31_spill]]  ;;  %s2798_s12 = sld [smem:[#allocation30_spill]] }
  0xdf   : > { %s2540_s26 = sand.u32 1, %s2795_s21  }
  0xe0   : > { %p491_p2 = scmp.lt.s32.totalorder %s2796_s7, 1  ;;  %s1513_s29 = sshll.u32 %s2540_s26, 3 }
  0xe1   : > { %s2550_s28 = scalar_lea.vmem [#allocation14], %s1513_s29  ;;  %s2552_s27 = scalar_lea.vmem [#allocation15], %s1513_s29 }
  0xe2   : > { %s2828_s7 = smov (!%p491_p2, %s2796_s7), 1  ;;  %p1516_p8 = scmp.ne.s32.totalorder %s2798_s12, 0 }
  0xe3   : > { %s1515_s20 = sshll.u32 %s2828_s7, 3  ;;  %v2197_v0 = vmov (!%p1516_p8), 0.0  }
  0xe4   : > { %s2548_s2 = scalar_lea.vmem %s2797_s18, %s1515_s20  ;;  %499 = sbr.rel (%p1516_p8) target bundleno = 235 (0xeb), region = 76  ;;  %500 = vst [vmem:[#allocation2] sm:$0xff] (!%p1516_p8), %v2197_v0 }
  0xeb PF: > { %v501_v1 = vld [vmem:[%s426_s19] sm:$0xff]  ;;  %v523_v2 = vlaneseq  ;;  %v2198_v20 = vmov 839922192   ;;  %v2199_v22 = vmov 1985246804   ;;  %vm814_vm0 = vcmask 1041409  }
  0xec   : > { %v502_v3 = vpack.c.bf16 %v501_v1, %v501_v1  ;;  %v591_v21 = vunpack.c.l.s4 %v2198_v20  ;;  %v598_v23 = vunpack.c.l.s4 %v2199_v22  ;;  %v508_v28 = vld [vmem:[%s2516_s30 + $0x10] sm:$0xf]  ;;  %v509_v29 = vld [vmem:[%s2516_s30 + $0x14] sm:$0xf]  ;;  %v504_v31 = vld [vmem:[%s2516_s30] sm:$0xf] }
  0xed   : > { %v524_v4 = vshrl.u32 %v523_v2, 7  ;;  %v505_v32 = vld [vmem:[%s2516_s30 + $0x4] sm:$0xf]  ;;  %v510_v42 = vld [vmem:[%s2516_s30 + $0x18] sm:$0xf]  ;;  %vm816_vm1 = vcmask 1042434  }
  0xee   : > { %v521_v5 = vpack.i.b16 %v502_v3, %v502_v3  ;;  %v530_v6 = vshrl.u32 %v502_v3, 16  ;;  %v592_v24 = vunpack.c.0.s8 %v591_v21  ;;  %v599_v25 = vunpack.c.0.s8 %v598_v23  ;;  %v511_v49 = vld [vmem:[%s2516_s30 + $0x1c] sm:$0xf]  ;;  %v506_v50 = vld [vmem:[%s2516_s30 + $0x8] sm:$0xf]  ;;  %s2799_s24 = sld [smem:[#allocation30_spill]] }
  0xef   : > { %v542_v7 = vsub.s32 1, %v524_v4  ;;  %v525_v8 = vsub.s32 0, %v524_v4  ;;  %v556_v14 = vsub.s32 2, %v524_v4  ;;  %v570_v17 = vsub.s32 3, %v524_v4  ;;  %v507_v51 = vld [vmem:[%s2516_s30 + $0xc] sm:$0xf] }
  0xf0   : > { %v531_v9 = vpack.i.b16 %v530_v6, %v530_v6  ;;  %v2555_v26 = vsub.s32 %v592_v24, %v524_v4  ;;  %v2557_v27 = vsub.s32 %v599_v25, %v524_v4  ;;  %v514_v62 = vld [vmem:[%s2516_s30 + $0x28] sm:$0xf]  ;;  %v515_v63 = vld [vmem:[%s2516_s30 + $0x2c] sm:$0xf]  ;;  %vm818_vm2 = vcmask 1043459  }
  0xf1   : > { %v543_v10 = vrot.slane %v521_v5, %v542_v7  ;;  %v526_v11 = vrot.slane %v521_v5, %v525_v8  ;;  %v557_v16 = vrot.slane %v521_v5, %v556_v14  ;;  %v571_v19 = vrot.slane %v521_v5, %v570_v17 }
  0xf2   : > { %v550_v12 = vrot.slane %v531_v9, %v542_v7  ;;  %v536_v13 = vrot.slane %v531_v9, %v525_v8  ;;  %v564_v15 = vrot.slane %v531_v9, %v556_v14  ;;  %v578_v18 = vrot.slane %v531_v9, %v570_v17  ;;  %v513_v14 = vld [vmem:[%s2516_s30 + $0x24] sm:$0xf] }
  0xf3   : > { %545 = vbcast.lane.c.b16.xlu1 %v543_v10, 256  ;;  %528 = vbcast.lane.c.b16.xlu0 %v526_v11, 256  ;;  %vm820_vm3 = vcmask 1044484   ;;  %vm822_vm4 = vcmask 1045509   ;;  %vm824_vm5 = vcmask 1046534   ;;  %vm826_vm6 = vcmask 1047559  }
  0xf4   : > { %p1517_p3 = scmp.ne.s32.totalorder %s2799_s24, 1 }
  0xf5   : > { %vm2202_vm7 = vmmov (!%p1517_p3), 0  }
  0xf7   : > { %552 = vbcast.lane.c.b16.xlu1 %v550_v12, 256  ;;  %538 = vbcast.lane.c.b16.xlu0 %v536_v13, 256  ;;  %v512_v13 = vld [vmem:[%s2516_s30 + $0x20] sm:$0xf] }
  0xfb   : > { %566 = vbcast.lane.c.b16.xlu1 %v564_v15, 256  ;;  %559 = vbcast.lane.c.b16.xlu0 %v557_v16, 256 }
  0xff   : > { %580 = vbcast.lane.c.b16.xlu1 %v578_v18, 256  ;;  %573 = vbcast.lane.c.b16.xlu0 %v571_v19, 256 }
 0x165   : > { %v546_v30 = vpop.permute.xlu1 %545  ;;  %v529_v33 = vpop.permute.xlu0 %528 }
 0x166   : > { %v624_v34 = vrot.slane %v546_v30, %v2555_v26  ;;  %v631_v35 = vrot.slane %v546_v30, %v2557_v27  ;;  %v596_v36 = vrot.slane %v529_v33, %v2555_v26  ;;  %v603_v37 = vrot.slane %v529_v33, %v2557_v27 }
 0x168   : > { %v722_v38 = vmul.bf16 %v624_v34, %v508_v28  ;;  %v723_v39 = vmul.bf16 %v631_v35, %v509_v29  ;;  %v718_v40 = vmul.bf16 %v596_v36, %v504_v31  ;;  %v719_v41 = vmul.bf16 %v603_v37, %v505_v32  ;;  %v518_v31 = vld [vmem:[%s2516_s30 + $0x38] sm:$0xf]  ;;  %v519_v37 = vld [vmem:[%s2516_s30 + $0x3c] sm:$0xf] }
 0x169   : > { %v553_v43 = vpop.permute.xlu1 %552  ;;  %v539_v44 = vpop.permute.xlu0 %538 }
 0x16a   : > { %v738_v45 = vunpack.c.l.bf16 %v722_v38  ;;  %v739_v46 = vunpack.c.l.bf16 %v723_v39  ;;  %v734_v47 = vunpack.c.l.bf16 %v718_v40  ;;  %v735_v48 = vunpack.c.l.bf16 %v719_v41 }
 0x16b   : > { %v638_v52 = vrot.slane %v553_v43, %v2555_v26  ;;  %v645_v53 = vrot.slane %v553_v43, %v2557_v27  ;;  %v610_v54 = vrot.slane %v539_v44, %v2555_v26  ;;  %v617_v55 = vrot.slane %v539_v44, %v2557_v27 }
 0x16c   : > { %v764_v56 = vadd.f32 %v739_v46, %v738_v45  ;;  %v750_v57 = vadd.f32 %v735_v48, %v734_v47 }
 0x16d   : > { %v724_v58 = vmul.bf16 %v638_v52, %v510_v42  ;;  %v725_v59 = vmul.bf16 %v645_v53, %v511_v49  ;;  %v720_v60 = vmul.bf16 %v610_v54, %v506_v50  ;;  %v721_v61 = vmul.bf16 %v617_v55, %v507_v51  ;;  %v567_v0 = vpop.permute.xlu1 %566  ;;  %v560_v5 = vpop.permute.xlu0 %559  ;;  %v516_v52 = vld [vmem:[%s2516_s30 + $0x30] sm:$0xf]  ;;  %v517_v53 = vld [vmem:[%s2516_s30 + $0x34] sm:$0xf] }
 0x16e   : > { %v765_v1 = vrot.slane %v764_v56, 4  ;;  %v751_v2 = vrot.slane %v750_v57, 4  ;;  %v666_v3 = vrot.slane %v567_v0, %v2555_v26  ;;  %v673_v4 = vrot.slane %v567_v0, %v2557_v27 }
 0x16f   : > { %v740_v6 = vunpack.c.l.bf16 %v724_v58  ;;  %v741_v7 = vunpack.c.l.bf16 %v725_v59  ;;  %v736_v8 = vunpack.c.l.bf16 %v720_v60  ;;  %v737_v9 = vunpack.c.l.bf16 %v721_v61 }
 0x170   : > { %v752_v10 = vadd.f32 %v751_v2, %v750_v57  ;;  %v728_v11 = vmul.bf16 %v666_v3, %v514_v62  ;;  %v729_v12 = vmul.bf16 %v673_v4, %v515_v63  ;;  %v652_v17 = vrot.slane %v560_v5, %v2555_v26 }
 0x171   : > { %v771_v15 = vadd.f32 %v741_v7, %v740_v6  ;;  %v757_v16 = vadd.f32 %v737_v9, %v736_v8  ;;  %v659_v18 = vrot.slane %v560_v5, %v2557_v27  ;;  %v581_v19 = vpop.permute.xlu1 %580  ;;  %v766_v20 = vadd.f32 %v765_v1, %v764_v56  ;;  %v574_v45 = vpop.permute.xlu0 %573 }
 0x172   : > { %v753_v21 = vrot.slane %v752_v10, 2  ;;  %v744_v22 = vunpack.c.l.bf16 %v728_v11  ;;  %v745_v23 = vunpack.c.l.bf16 %v729_v12  ;;  %v726_v28 = vmul.bf16 %v652_v17, %v512_v13 }
 0x173   : > { %v772_v24 = vrot.slane %v771_v15, 4  ;;  %v758_v25 = vrot.slane %v757_v16, 4  ;;  %v727_v29 = vmul.bf16 %v659_v18, %v513_v14  ;;  %v694_v32 = vrot.slane %v581_v19, %v2555_v26 }
 0x174   : > { %v785_v30 = vadd.f32 %v745_v23, %v744_v22  ;;  %v742_v35 = vunpack.c.l.bf16 %v726_v28  ;;  %v767_v38 = vrot.slane %v766_v20, 2  ;;  %v701_v40 = vrot.slane %v581_v19, %v2557_v27 }
 0x175   : > { %v773_v33 = vadd.f32 %v772_v24, %v771_v15  ;;  %v759_v34 = vadd.f32 %v758_v25, %v757_v16  ;;  %v743_v36 = vunpack.c.l.bf16 %v727_v29  ;;  %v754_v41 = vadd.f32 %v753_v21, %v752_v10 }
 0x176   : > { %v786_v39 = vrot.slane %v785_v30, 4  ;;  %v732_v44 = vmul.bf16 %v694_v32, %v518_v31  ;;  %v733_v47 = vmul.bf16 %v701_v40, %v519_v37  ;;  %v768_v54 = vadd.f32 %v767_v38, %v766_v20  ;;  %v1840_v40 = vld [vmem:[#allocation8] sm:$0xff] (!%p1517_p3)  }
 0x177   : > { %v760_v42 = vrot.slane %v759_v34, 2  ;;  %v778_v43 = vadd.f32 %v743_v36, %v742_v35  ;;  %v774_v46 = vrot.slane %v773_v33, 2  ;;  %v680_v56 = vrot.slane %v574_v45, %v2555_v26 }
 0x178   : > { %v787_v49 = vadd.f32 %v786_v39, %v785_v30  ;;  %v748_v51 = vunpack.c.l.bf16 %v732_v44  ;;  %v749_v55 = vunpack.c.l.bf16 %v733_v47  ;;  %v687_v57 = vrot.slane %v574_v45, %v2557_v27  ;;  %v836_v39 = vld [vmem:[%s2548_s2] sm:$0xff] (!%p1517_p3)  ;;  %v1842_v44 = vld [vmem:[#allocation8 + $0x10] sm:$0xff] (!%p1517_p3)   ;;  %v1843_v45 = vld [vmem:[#allocation8 + $0x18] sm:$0xff] (!%p1517_p3)  }
 0x179   : > { %v761_v48 = vadd.f32 %v760_v42, %v759_v34  ;;  %v779_v50 = vrot.slane %v778_v43, 4  ;;  %v755_v58 = vrot.slane %v754_v41, 1  ;;  %v730_v62 = vmul.bf16 %v680_v56, %v516_v52  ;;  %v503_v34 = vld [vmem:[#allocation2] sm:$0xff]  ;;  %v1858_v52 = vld [vmem:[#allocation9 + $0x10] sm:$0xff] (!%p1517_p3)  }
 0x17a   : > { %v799_v61 = vadd.f32 %v749_v55, %v748_v51  ;;  %v731_v63 = vmul.bf16 %v687_v57, %v517_v53  ;;  %v775_v0 = vadd.f32 %v774_v46, %v773_v33  ;;  %v788_v2 = vrot.slane %v787_v49, 2  ;;  %v1844_v46 = vld [vmem:[#allocation8 + $0x20] sm:$0xff] (!%p1517_p3)   ;;  %v1845_v47 = vld [vmem:[#allocation8 + $0x28] sm:$0xff] (!%p1517_p3)   ;;  %v1859_v53 = vld [vmem:[#allocation9 + $0x18] sm:$0xff] (!%p1517_p3)  }
 0x17b   : > { %v762_v59 = vrot.slane %v761_v48, 1  ;;  %v780_v60 = vadd.f32 %v779_v50, %v778_v43  ;;  %v769_v4 = vrot.slane %v768_v54, 1  ;;  %v746_v6 = vunpack.c.l.bf16 %v730_v62  ;;  %v1841_v43 = vld [vmem:[#allocation8 + $0x8] sm:$0xff] (!%p1517_p3)   ;;  %v1856_v50 = vld [vmem:[#allocation9] sm:$0xff] (!%p1517_p3)   ;;  %v1862_v56 = vld [vmem:[#allocation9 + $0x30] sm:$0xff] (!%p1517_p3)  }
 0x17c   : > { %v800_v5 = vrot.slane %v799_v61, 4  ;;  %v747_v7 = vunpack.c.l.bf16 %v731_v63  ;;  %v756_v8 = vadd.f32 %v755_v58, %v754_v41  ;;  %v776_v27 = vrot.slane %v775_v0, 1  ;;  %v1857_v51 = vld [vmem:[#allocation9 + $0x8] sm:$0xff] (!%p1517_p3)   ;;  %v1863_v57 = vld [vmem:[#allocation9 + $0x38] sm:$0xff] (!%p1517_p3)  }
 0x17d   : > { %v763_v1 = vadd.f32 %v762_v59, %v761_v48  ;;  %v781_v3 = vrot.slane %v780_v60, 2  ;;  %v789_v12 = vadd.f32 %v788_v2, %v787_v49  ;;  %v770_v13 = vadd.f32 %v769_v4, %v768_v54  ;;  %v1846_v48 = vld [vmem:[#allocation8 + $0x30] sm:$0xff] (!%p1517_p3)   ;;  %v1847_v49 = vld [vmem:[#allocation8 + $0x38] sm:$0xff] (!%p1517_p3)   ;;  %v1860_v54 = vld [vmem:[#allocation9 + $0x20] sm:$0xff] (!%p1517_p3)  }
 0x17e   : > { %v801_v26 = vadd.f32 %v800_v5, %v799_v61  ;;  %v792_v10 = vadd.f32 %v747_v7, %v746_v6  ;;  %v777_v20 = vadd.f32 %v776_v27, %v775_v0  ;;  %v2200_v41 = vmov (!%p1517_p3), 0   ;;  %v1861_v55 = vld [vmem:[#allocation9 + $0x28] sm:$0xff] (!%p1517_p3)   ;;  %v1848_v61 = vld [vmem:[#allocation11] sm:$0xff] (!%p1517_p3)   ;;  %v1850_v0 = vld [vmem:[#allocation11 + $0x10] sm:$0xff] (!%p1517_p3)  }
 0x17f   : > { %v782_v9 = vadd.f32 %v781_v3, %v780_v60  ;;  %v815_v11 = vsel %vm814_vm0, %v763_v1, %v756_v8  ;;  %v790_v21 = vrot.slane %v789_v12, 1  ;;  %1839 = vset.pattern.permute.xlu0 (!%p1517_p3), %v2200_v41  ;;  %v2201_v42 = vmov (!%p1517_p3), 0.0   ;;  %v1849_v63 = vld [vmem:[#allocation11 + $0x8] sm:$0xff] (!%p1517_p3)   ;;  %v1851_v1 = vld [vmem:[#allocation11 + $0x18] sm:$0xff] (!%p1517_p3)   ;;  %v1852_v2 = vld [vmem:[#allocation11 + $0x20] sm:$0xff] (!%p1517_p3)  }
 0x180   : > { %v802_v15 = vrot.slane %v801_v26, 2  ;;  %v793_v16 = vrot.slane %v792_v10, 4  ;;  %v817_v17 = vsel %vm816_vm1, %v770_v13, %v815_v11  ;;  %1593 = vmatprep.subr.bf16.mxu0 (!%p1517_p3), %v2201_v42  ;;  %839 = vperm.xlu0 (!%p1517_p3), %1839, %v836_v39   ;;  %v1853_v3 = vld [vmem:[#allocation11 + $0x28] sm:$0xff] (!%p1517_p3)   ;;  %v1854_v4 = vld [vmem:[#allocation11 + $0x30] sm:$0xff] (!%p1517_p3)   ;;  %v1855_v5 = vld [vmem:[#allocation11 + $0x38] sm:$0xff] (!%p1517_p3)  }
 0x181   : > { %v783_v14 = vrot.slane %v782_v9, 1  ;;  %v819_v24 = vsel %vm818_vm2, %v777_v20, %v817_v17  ;;  %v791_v29 = vadd.f32 %v790_v21, %v789_v12  ;;  %1594 = vmatpush3.bf16.msra.mxu0 (!%p1517_p3), %v1840_v40  ;;  %1613 = vmatprep.subr.bf16.mxu1 (!%p1517_p3), %v2201_v42  ;;  %v1864_v7 = vld [vmem:[#allocation12] sm:$0xff] (!%p1517_p3)   ;;  %v1865_v27 = vld [vmem:[#allocation12 + $0x8] sm:$0xff] (!%p1517_p3)   ;;  %v1866_v11 = vld [vmem:[#allocation12 + $0x10] sm:$0xff] (!%p1517_p3)  }
 0x182   : > { %v803_v18 = vadd.f32 %v802_v15, %v801_v26  ;;  %v794_v19 = vadd.f32 %v793_v16, %v792_v10  ;;  %1595 = vmatprep.subr.bf16.mxu0 (!%p1517_p3), %v2201_v42  ;;  %1609 = vmatprep.mubr.msk.bf16.mxu0 (!%p1517_p3), %vm2202_vm7, %v2201_v42  ;;  %v1867_v12 = vld [vmem:[#allocation12 + $0x18] sm:$0xff] (!%p1517_p3)   ;;  %v1868_v13 = vld [vmem:[#allocation12 + $0x20] sm:$0xff] (!%p1517_p3)   ;;  %v1870_v15 = vld [vmem:[#allocation12 + $0x30] sm:$0xff] (!%p1517_p3)  }
 0x183   : > { %v784_v22 = vadd.f32 %v783_v14, %v782_v9  ;;  %1629 = vmatprep.mubr.msk.bf16.mxu1 (!%p1517_p3), %vm2202_vm7, %v2201_v42  ;;  %1614 = vmatpush3.bf16.msra.mxu1 (!%p1517_p3), %v1856_v50  ;;  %v1869_v14 = vld [vmem:[#allocation12 + $0x28] sm:$0xff] (!%p1517_p3)   ;;  %v1871_v16 = vld [vmem:[#allocation12 + $0x38] sm:$0xff] (!%p1517_p3)  }
 0x184   : > { %v795_v23 = vrot.slane %v794_v19, 2  ;;  %v804_v25 = vrot.slane %v803_v18, 1  ;;  %1615 = vmatprep.subr.bf16.mxu1 (!%p1517_p3), %v2201_v42 }
 0x185   : > { %v821_v30 = vsel %vm820_vm3, %v784_v22, %v819_v24  ;;  %1596 = vmatpush3.bf16.msra.mxu0 (!%p1517_p3), %v1841_v43 }
 0x186   : > { %v796_v28 = vadd.f32 %v795_v23, %v794_v19  ;;  %v805_v32 = vadd.f32 %v804_v25, %v803_v18  ;;  %v823_v35 = vsel %vm822_vm4, %v791_v29, %v821_v30  ;;  %1597 = vmatprep.subr.bf16.mxu0 (!%p1517_p3), %v2201_v42 }
 0x187   : > { %1616 = vmatpush3.bf16.msra.mxu1 (!%p1517_p3), %v1857_v51 }
 0x188   : > { %v797_v31 = vrot.slane %v796_v28, 1  ;;  %1617 = vmatprep.subr.bf16.mxu1 (!%p1517_p3), %v2201_v42 }
 0x189   : > { %1598 = vmatpush3.bf16.msra.mxu0 (!%p1517_p3), %v1842_v44 }
 0x18a   : > { %v798_v33 = vadd.f32 %v797_v31, %v796_v28  ;;  %834 = sbr.rel (%p1517_p3) target bundleno = 977 (0x3d1), region = 80  ;;  %1599 = vmatprep.subr.bf16.mxu0 (!%p1517_p3), %v2201_v42 }
 0x18b   : > { %1618 = vmatpush3.bf16.msra.mxu1 (!%p1517_p3), %v1858_v52 }
 0x18c   : > { %v825_v36 = vsel %vm824_vm5, %v798_v33, %v823_v35  ;;  %1619 = vmatprep.subr.bf16.mxu1 (!%p1517_p3), %v2201_v42 }
 0x18d   : > { %v827_v37 = vsel %vm826_vm6, %v805_v32, %v825_v36  ;;  %1600 = vmatpush3.bf16.msra.mxu0 (!%p1517_p3), %v1843_v45 }
 0x18e   : > { %v829_v38 = vadd.f32 %v827_v37, %v503_v34  ;;  %1601 = vmatprep.subr.bf16.mxu0 (!%p1517_p3), %v2201_v42 }
 0x18f   : > { %1620 = vmatpush3.bf16.msra.mxu1 (!%p1517_p3), %v1859_v53 }
 0x190   : > { %830 = vst [vmem:[#allocation2] sm:$0xff] %v829_v38  ;;  %1621 = vmatprep.subr.bf16.mxu1 (!%p1517_p3), %v2201_v42 }
 0x191   : > { %1602 = vmatpush3.bf16.msra.mxu0 %v1844_v46 }
 0x192   : > { %1603 = vmatprep.subr.bf16.mxu0 %v2201_v42 }
 0x193   : > { %1622 = vmatpush3.bf16.msra.mxu1 %v1860_v54 }
 0x194   : > { %1623 = vmatprep.subr.bf16.mxu1 %v2201_v42 }
 0x195   : > { %1604 = vmatpush3.bf16.msra.mxu0 %v1845_v47 }
 0x196   : > { %1605 = vmatprep.subr.bf16.mxu0 %v2201_v42 }
 0x197   : > { %1624 = vmatpush3.bf16.msra.mxu1 %v1861_v55  ;;  %v835_v58 = vld [vmem:[#allocation2] sm:$0xff] }
 0x198   : > { %1625 = vmatprep.subr.bf16.mxu1 %v2201_v42 }
 0x199   : > { %1606 = vmatpush3.bf16.msra.mxu0 %v1846_v48 }
 0x19a   : > { %1607 = vmatprep.subr.bf16.mxu0 %v2201_v42 }
 0x19b   : > { %1626 = vmatpush3.bf16.msra.mxu1 %v1862_v56 }
 0x19c   : > { %1627 = vmatprep.subr.bf16.mxu1 %v2201_v42 }
 0x19d   : > { %1608 = vmatpush3.bf16.msra.mxu0 %v1847_v49 }
 0x19e   : > { %1633 = vmatprep.subr.bf16.mxu0 %v2201_v42 }
 0x19f   : > { %1628 = vmatpush3.bf16.msra.mxu1 %v1863_v57 }
 0x1a0   : > { %1653 = vmatprep.subr.bf16.mxu1 %v2201_v42 }
 0x1ff   : > { %v840_v59 = vpop.permute.xlu0 %839 }
 0x200   : > { %v2616_v60 = vmul.f32 %v840_v59, %v835_v58 }
 0x202   : > { %v843_v62 = vpack.c.bf16 %v2616_v60, %v2616_v60 }
 0x204   : > { %1610 = vmatmul.mubr.bf16.vlgmr.msra.gmra.mrb[0].mxu0 %v843_v62 }
 0x205   : > { %1634 = vmatpush3.bf16.msra.mxu0 %v1848_v61  ;;  %1649 = vmatprep.mubr.msk.bf16.mxu0 %vm2202_vm7, %v2201_v42 }
 0x206   : > { %1635 = vmatprep.subr.bf16.mxu0 %v2201_v42 }
 0x209   : > { %1636 = vmatpush3.bf16.msra.mxu0 %v1849_v63 }
 0x20a   : > { %1637 = vmatprep.subr.bf16.mxu0 %v2201_v42 }
 0x20d   : > { %1638 = vmatpush3.bf16.msra.mxu0 %v1850_v0 }
 0x20e   : > { %1639 = vmatprep.subr.bf16.mxu0 %v2201_v42 }
 0x211   : > { %1640 = vmatpush3.bf16.msra.mxu0 %v1851_v1 }
 0x212   : > { %1641 = vmatprep.subr.bf16.mxu0 %v2201_v42 }
 0x215   : > { %1642 = vmatpush3.bf16.msra.mxu0 %v1852_v2 }
 0x216   : > { %1643 = vmatprep.subr.bf16.mxu0 %v2201_v42 }
 0x219   : > { %1644 = vmatpush3.bf16.msra.mxu0 %v1853_v3 }
 0x21a   : > { %1645 = vmatprep.subr.bf16.mxu0 %v2201_v42 }
 0x21d   : > { %1646 = vmatpush3.bf16.msra.mxu0 %v1854_v4 }
 0x21e   : > { %1647 = vmatprep.subr.bf16.mxu0 %v2201_v42 }
 0x221   : > { %1648 = vmatpush3.bf16.msra.mxu0 %v1855_v5 }
 0x224   : > { %1650 = vmatmul.mubr.bf16.vlgmr.msra.gmra.mrb[4].mxu0 %v843_v62 }
 0x2d7   : > { %v942_v6 = vpop.f32.mrb[0].mxu0 }
 0x2d8   : > { %v948_v8 = vpack.c.bf16 %v942_v6, %v942_v6  ;;  %v1611_v9 = vpop.f32.mrb[1].mxu0 }
 0x2d9   : > { %v945_v26 = vpop.f32.mrb[2].mxu0 }
 0x2da   : > { %v1612_v10 = vpop.f32.mrb[3].mxu0  ;;  %1630 = vmatmul.mubr.bf16.vlgmr.msra.gmra.mrb[0].mxu1 %v948_v8 }
 0x2db   : > { %1654 = vmatpush3.bf16.msra.mxu1 %v1864_v7  ;;  %1669 = vmatprep.mubr.msk.bf16.mxu1 %vm2202_vm7, %v2201_v42 }
 0x2dc   : > { %1655 = vmatprep.subr.bf16.mxu1 %v2201_v42 }
 0x2df   : > { %1656 = vmatpush3.bf16.msra.mxu1 %v1865_v27 }
 0x2e0   : > { %1657 = vmatprep.subr.bf16.mxu1 %v2201_v42 }
 0x2e3   : > { %1658 = vmatpush3.bf16.msra.mxu1 %v1866_v11 }
 0x2e4   : > { %1659 = vmatprep.subr.bf16.mxu1 %v2201_v42 }
 0x2e7   : > { %1660 = vmatpush3.bf16.msra.mxu1 %v1867_v12 }
 0x2e8   : > { %1661 = vmatprep.subr.bf16.mxu1 %v2201_v42 }
 0x2eb   : > { %1662 = vmatpush3.bf16.msra.mxu1 %v1868_v13 }
 0x2ec   : > { %1663 = vmatprep.subr.bf16.mxu1 %v2201_v42 }
 0x2ef   : > { %1664 = vmatpush3.bf16.msra.mxu1 %v1869_v14 }
 0x2f0   : > { %1665 = vmatprep.subr.bf16.mxu1 %v2201_v42 }
 0x2f3   : > { %1666 = vmatpush3.bf16.msra.mxu1 %v1870_v15 }
 0x2f4   : > { %1667 = vmatprep.subr.bf16.mxu1 %v2201_v42 }
 0x2f7   : > { %v1153_v17 = vpop.f32.mrb[4].mxu0  ;;  %1668 = vmatpush3.bf16.msra.mxu1 %v1871_v16 }
 0x2f8   : > { %v1651_v18 = vpop.f32.mrb[5].mxu0 }
 0x2f9   : > { %v1156_v19 = vpop.f32.mrb[6].mxu0 }
 0x2fa   : > { %v1652_v20 = vpop.f32.mrb[7].mxu0  ;;  %1670 = vmatmul.mubr.bf16.vlgmr.msra.gmra.mrb[4].mxu1 %v948_v8 }
 0x3ad   : > { %v1047_v21 = vpop.f32.mrb[0].mxu1 }
 0x3ae   : > { %v1053_v22 = vsub.f32 %v2616_v60, %v1047_v21  ;;  %v1631_v23 = vpop.f32.mrb[1].mxu1 }
 0x3af   : > { %v1050_v24 = vpop.f32.mrb[2].mxu1 }
 0x3b0   : > { %1054 = vst [vmem:[%s2552_s27] sm:$0xff] %v1053_v22  ;;  %v1632_v25 = vpop.f32.mrb[3].mxu1 }
 0x3cd   : > { %v1257_v28 = vpop.f32.mrb[4].mxu1 }
 0x3ce   : > { %v1263_v29 = vsub.f32 %v1153_v17, %v1257_v28  ;;  %v1671_v30 = vpop.f32.mrb[5].mxu1 }
 0x3cf   : > { %v1260_v31 = vpop.f32.mrb[6].mxu1 }
 0x3d0   : > { %1264 = vst [vmem:[%s2550_s28] sm:$0xff] %v1263_v29  ;;  %v1672_v32 = vpop.f32.mrb[7].mxu1 }
 0x3d1 PF: > { %s2800_s11 = sld [smem:[#allocation31_spill]]  ;;  %s2801_s30 = sld [smem:[#allocation36_spill]] }
 0x3d2   : > { %s2802_s17 = sld [smem:[#allocation41_spill]]  ;;  %s1284_s21 = sshll.u32 %s2550_s28, 4  ;;  %s1285_s21 = int_to_ptr.vmem [resolvable:$true] %s1284_s21 }
 0x3d3   : > { %s1266_s7 = scalar_lea.sflag [#allocation5], %s2540_s26  ;;  %s2012_s29 = scalar_lea.vmem %s1285_s21, 128 }
 0x3d4   : > { %p2013_p11 = scmp.ne.s32.totalorder %s1285_s21, %s2012_s29  ;;  %s2203_s20 = smov [#allocation14]  }
 0x3d5   : > { %s2016_s25 = sshll.u32 %s2203_s20, 4  ;;  %s2017_s25 = int_to_ptr.vmem [resolvable:$false] %s2016_s25 }
 0x3d6   : > { %s2018_s8 = scalar_lea.vmem %s2017_s25, 256  ;;  %p2019_p4 = scmp.lt.s32.totalorder %s1285_s21, %s2017_s25 }
 0x3d7   : > { %s1552_s23 = sshll.u32 %s2800_s11, 7  ;;  %p2803_p6 = scmp.ne.s32.totalorder %s2801_s30, 0 }
 0x3d8   : > { %s2647_s19 = scalar_lea.hbm %s2802_s17, %s1552_s23  ;;  %p2020_p9 = scmp.lt.s32.totalorder %s2018_s8, %s2012_s29 }
 0x3d9   : > { %p2014_p12 = pnand %p2013_p11, %p2803_p6 }
 0x3da   : > { %p2021_p5 = por %p2020_p9, %p2019_p4 }
 0x3db   : > { %p2015_p7 = pneg %p2014_p12 }
 0x3dd   : > { %p2022_p10 = pnand %p2021_p5, %p2015_p7 }
 0x3df   : > { %2025 = shalt.err (!%p2022_p10)
}
 0x3e0   : > { %s2026_s18 = scalar_lea.hbm %s2647_s19, 128  ;;  %s2030_s12 = scalar_lea.hbm %s2802_s17, 256 }
 0x3e1   : > { %p2027_p13 = scmp.ne.s32.totalorder %s2647_s19, %s2026_s18  ;;  %p2031_p2 = scmp.lt.u32.totalorder %s2647_s19, %s2802_s17 }
 0x3e2   : > { %p2032_p8 = scmp.lt.u32.totalorder %s2030_s12, %s2026_s18  ;;  %p2034_p11 = scmp.lt.u32.totalorder %s2026_s18, %s2647_s19 }
 0x3e3   : > { %p2028_p0 = pnand %p2027_p13, %p2803_p6 }
 0x3e4   : > { %p2033_p3 = por %p2032_p8, %p2031_p2 }
 0x3e5   : > { %p2029_p1 = pneg %p2028_p0 }
 0x3e6   : > { %p2035_p12 = por %p2034_p11, %p2033_p3 }
 0x3e8   : > { %p2036_p7 = pnand %p2035_p12, %p2029_p1 }
 0x3ea   : > { %2039 = shalt.err (!%p2036_p7)
}
 0x3eb   : > { %1700 = dma.vmem_to_hbm [thread:$0]  (%p2803_p6), %s1285_s21, 128, %s2647_s19, %s1266_s7  }
 0x3ec   : > { %s2804_s20 = sld [smem:[#allocation42_spill]]  ;;  %s1297_s8 = sshll.u32 %s2552_s27, 4  ;;  %s1298_s8 = int_to_ptr.vmem [resolvable:$true] %s1297_s8 }
 0x3ed   : > { %s1271_s18 = scalar_lea.sflag [#allocation16], %s2540_s26  ;;  %s2040_s2 = scalar_lea.vmem %s1298_s8, 128 }
 0x3ee   : > { %p2041_p4 = scmp.ne.s32.totalorder %s1298_s8, %s2040_s2  ;;  %s2204_s28 = smov [#allocation15]  }
 0x3ef   : > { %s2044_s12 = sshll.u32 %s2204_s28, 4  ;;  %s2045_s12 = int_to_ptr.vmem [resolvable:$false] %s2044_s12 }
 0x3f0   : > { %p2042_p9 = pnand %p2041_p4, %p2803_p6  ;;  %s2046_s24 = scalar_lea.vmem %s2045_s12, 256 }
 0x3f1   : > { %p2047_p10 = scmp.lt.s32.totalorder %s1298_s8, %s2045_s12  ;;  %p2048_p13 = scmp.lt.s32.totalorder %s2046_s24, %s2040_s2 }
 0x3f2   : > { %s2673_s25 = scalar_lea.hbm %s2804_s20, %s1552_s23  ;;  %p2043_p5 = pneg %p2042_p9 }
 0x3f3   : > { %p2049_p0 = por %p2048_p13, %p2047_p10 }
 0x3f5   : > { %p2050_p1 = pnand %p2049_p0, %p2043_p5 }
 0x3f7   : > { %2053 = shalt.err (!%p2050_p1)
}
 0x3f8   : > { %s2054_s26 = scalar_lea.hbm %s2673_s25, 128  ;;  %s2058_s23 = scalar_lea.hbm %s2804_s20, 256 }
 0x3f9   : > { %p2055_p2 = scmp.ne.s32.totalorder %s2673_s25, %s2054_s26  ;;  %p2059_p11 = scmp.lt.u32.totalorder %s2673_s25, %s2804_s20 }
 0x3fa   : > { %p2060_p12 = scmp.lt.u32.totalorder %s2058_s23, %s2054_s26  ;;  %p2062_p4 = scmp.lt.u32.totalorder %s2054_s26, %s2673_s25 }
 0x3fb   : > { %p2056_p8 = pnand %p2055_p2, %p2803_p6 }
 0x3fc   : > { %p2061_p7 = por %p2060_p12, %p2059_p11 }
 0x3fd   : > { %p2057_p3 = pneg %p2056_p8 }
 0x3fe   : > { %p2063_p9 = por %p2062_p4, %p2061_p7 }
 0x400   : > { %p2064_p5 = pnand %p2063_p9, %p2057_p3 }
 0x402   : > { %2067 = shalt.err (!%p2064_p5)
}
 0x403   : > { %1701 = dma.vmem_to_hbm [thread:$0]  (%p2803_p6), %s1298_s8, 128, %s2673_s25, %s1271_s18  }
 0x404 PF: > { %s2805_s7 = sld [smem:[#allocation27_spill]]  ;;  %s2806_s22 = sld [smem:[#allocation39_spill]] }
 0x405   : > { %p1732_p10 = scmp.ge.s32.totalorder %s2182_s15, 2 }
 0x40a   : > { %s1309_s16 = sand.u32 1, %s2805_s7   ;;  %p2807_p13 = scmp.ne.s32.totalorder %s2806_s22, 0 }
 0x40b   : > { %s1310_s29 = scalar_lea.sflag [#allocation5], %s1309_s16 }
 0x40c   : > { %p1718_p0 = pnand %p1732_p10, %p2807_p13 }
 0x40e   : > { %2133 = dma.done.wait (!%p1718_p0), %s1310_s29, 128  }
 0x40f   : > { %2135 = vsyncadd (!%p1718_p0), %s1310_s29, 4294967168  ;;  %s1319_s2 = scalar_lea.sflag [#allocation16], %s1309_s16 }
 0x410   : > { %2137 = dma.done.wait (!%p1718_p0), %s1319_s2, 128  }
 0x411   : > { %2139 = vsyncadd (!%p1718_p0), %s1319_s2, 4294967168  ;;  %s33_s15 = sadd.s32 1, %s2182_s15   ;;  %s2808_s27 = sld [smem:[#allocation28_spill]] }
 0x412   : > { %p30_p1 = scmp.ge.s32.totalorder %s33_s15, 6   ;;  %s2809_s28 = sld [smem:[#allocation29_spill]] }
 0x413   : > { %s2810_s29 = sld [smem:[#allocation37_spill]]  ;;  %s2811_s25 = sld [smem:[#allocation38_spill]] }
 0x414   : > { %s2812_s8 = sld [smem:[#allocation33_spill]]  ;;  %s2813_s18 = sld [smem:[#allocation34_spill]] }
 0x415   : > { %s2814_s30 = smov %s2158_s9  ;;  %s2815_s9 = smov %s2162_s10 }
 0x416   : > { %s2817_s11 = smov %s2174_s13  ;;  %s2818_s12 = smov %s2178_s14 }
 0x417   :  { %32 = sbr.rel (!%p30_p1) target bundleno = 19 (0x13), region = 155 }
 0x419   : > { %s2816_s10 = smov %s2811_s25 }
 0x41a   : > { %s2819_s13 = smov %s2812_s8  ;;  %s2820_s14 = smov %s2813_s18 }
 0x41e   :  { %1324 = vsyncpa [#allocation4], 1 }
 0x41f   :  { %1326 = vsyncpa [#allocation4 + $0x1], 1 }
 0x420   :  { %1327 = vsyncpa [#allocation7], 1 }
 0x421   :  { %1329 = vsyncpa [#allocation7 + $0x1], 1 }
 0x422   :  { %1330 = vsyncpa [#allocation10], 1 }
 0x423   :  { %1331 = vsyncpa [#allocation13], 1 }
 0x424   :  { %1332 = vsyncpa [#allocation5], 1 }
 0x425   :  { %1334 = vsyncpa [#allocation5 + $0x1], 1 }
 0x426   :  { %1335 = vsyncpa [#allocation16], 1 }
 0x427   :  { %1337 = vsyncpa [#allocation16 + $0x1], 1 }

// kernel: tpu_custom_call.1
= control target key start
LH: loop header
LB: loop body
LE: loop exit
PB: predicated region body
PF: predicated region fallthrough
CT: control target
= control target key end

     0   :  { %s2731_s0 = inlined_call_operand.hbm [shape: bf16[16,32,128], index: 0, kind: input, shape index: {}]   ;;  %s2732_s1 = inlined_call_operand.hbm [shape: f32[2,16,16], index: 1, kind: input, shape index: {}]   ;;  %s2733_s2 = inlined_call_operand.vmem [shape: f32[16,1], index: 2, kind: input, shape index: {}]   ;;  %s2734_s3 = inlined_call_operand.hbm [shape: bf16[128,128], index: 3, kind: input, shape index: {}]   ;;  %s2735_s4 = inlined_call_operand.hbm [shape: bf16[128,128], index: 4, kind: input, shape index: {}]   ;;  %s2736_s5 = inlined_call_operand.hbm [shape: bf16[128,128], index: 5, kind: input, shape index: {}]   ;;  %s2737_s6 = inlined_call_operand.hbm [shape: bf16[128,128], index: 6, kind: input, shape index: {}]   ;;  %s2738_s7 = inlined_call_operand.hbm [shape: f32[16,128], index: 7, kind: output, shape index: {0}]   ;;  %s2739_s8 = inlined_call_operand.hbm [shape: f32[16,128], index: 8, kind: output, shape index: {1}]  }
   0x1   :  { %2761 = sst [smem:[#allocation40_spill]] %s2733_s2 }
   0x2   :  { %2762 = sst [smem:[#allocation41_spill]] %s2738_s7 }
   0x3   :  { %2763 = sst [smem:[#allocation42_spill]] %s2739_s8 }
   0x4   :  { %14 = vsyncpa [#allocation4], 0 }
   0x5   :  { %16 = vsyncpa [#allocation4 + $0x1], 0 }
   0x6   :  { %17 = vsyncpa [#allocation7], 0 }
   0x7   :  { %19 = vsyncpa [#allocation7 + $0x1], 0 }
   0x8   :  { %20 = vsyncpa [#allocation10], 0 }
   0x9   :  { %21 = vsyncpa [#allocation13], 0 }
   0xa   :  { %22 = vsyncpa [#allocation5], 0 }
   0xb   :  { %24 = vsyncpa [#allocation5 + $0x1], 0 }
   0xc   :  { %25 = vsyncpa [#allocation16], 0 }
   0xd   :  { %27 = vsyncpa [#allocation16 + $0x1], 0  ;;  %s2250_s27 = smov 0   ;;  %s2252_s28 = smov 0  }
   0xe   :  { %s2254_s29 = smov 0   ;;  %s2256_s30 = smov 0  }
   0xf   :  { %s2258_s9 = smov 0   ;;  %s2260_s10 = smov 0  }
  0x10   :  { %s2262_s11 = smov 0   ;;  %s2264_s12 = smov 0  }
  0x11   :  { %s2266_s13 = smov 0   ;;  %s2268_s14 = smov 0  }
  0x12   :  { %s2270_s15 = smov 0  }
  0x13 LB: > { %2764 = sst [smem:[#allocation27_spill]] %s2142_s27  ;;  %s2304_s16 = sadd.s32 4294967295, %s2182_s15   ;;  %s2182_s15 = sphi %s2270_s15, %s33_s15   ;;  %s2178_s14 = sphi %s2268_s14, %s2820_s14   ;;  %s2174_s13 = sphi %s2266_s13, %s2819_s13   ;;  %s2170_s12 = sphi %s2264_s12, %s2818_s12   ;;  %s2166_s11 = sphi %s2262_s11, %s2817_s11   ;;  %s2162_s10 = sphi %s2260_s10, %s2816_s10   ;;  %s2158_s9 = sphi %s2258_s9, %s2815_s9   ;;  %s2154_s30 = sphi %s2256_s30, %s2814_s30   ;;  %s2150_s29 = sphi %s2254_s29, %s2810_s29   ;;  %s2146_s28 = sphi %s2252_s28, %s2809_s28   ;;  %s2142_s27 = sphi %s2250_s27, %s2808_s27  }
  0x14   : > { %2765 = sst [smem:[#allocation28_spill]] %s2146_s28  ;;  %s1489_s17 = sadd.s32 4294967294, %s2182_s15  }
  0x15   : > { %2766 = sst [smem:[#allocation29_spill]] %s2150_s29  ;;  %s42_s18 = sadd.s32 1, %s2174_s13 }
  0x16   : > { %2767 = sst [smem:[#allocation30_spill]] %s2166_s11  ;;  %s45_s19 = sadd.s32 1, %s2178_s14 }
  0x17   : > { %2768 = sst [smem:[#allocation31_spill]] %s2170_s12  ;;  %p43_p0 = scmp.ge.s32.totalorder %s42_s18, 2 }
  0x18   : > { %2769 = sst [smem:[#allocation32_spill]] %s2304_s16  ;;  %s54_s20 = sadd.s32 1, %s2162_s10 }
  0x19   : > { %p61_p1 = scmp.ne.s32.totalorder %s2162_s10, %s2158_s9  ;;  %p62_p2 = scmp.eq.s32.totalorder %s2182_s15, 0 }
  0x1a   : > { %s2822_s18 = smov (%p43_p0, %s42_s18), 0  ;;  %s2824_s19 = smov (!%p43_p0, %s45_s19), %s2178_s14 }
  0x1b   : > { %2770 = sst [smem:[#allocation33_spill]] %s2822_s18  ;;  %s50_s21 = ssub.s32 %s2174_s13, %s2822_s18 }
  0x1c   : > { %p2318_p3 = por %p62_p2, %p61_p1  ;;  %p47_p4 = scmp.ge.s32.totalorder %s2824_s19, 2 }
  0x1d   : > { %p67_p5 = scmp.ne.s32.totalorder %s2158_s9, %s2154_s30  ;;  %p2746_p6 = scmp.eq.s32.totalorder %s2304_s16, 0 }
  0x1e   : > { %s2771_s22 = scalar_select %p2318_p3, 1, 0 }
  0x1f   : > { %s218_s23 = sadd.s32 1, %s2150_s29  ;;  %s2826_s19 = smov (%p47_p4, %s2824_s19), 0 }
  0x20   : > { %2772 = sst [smem:[#allocation34_spill]] %s2826_s19  ;;  %p2329_p7 = por %p2746_p6, %p67_p5 }
  0x21   : > { %p228_p8 = scmp.ne.s32.totalorder %s2150_s29, %s2146_s28  ;;  %s49_s25 = ssub.s32 %s2178_s14, %s2826_s19 }
  0x22   : > { %s2773_s24 = scalar_select %p2329_p7, 1, 0 }
  0x23   : > { %p229_p9 = scmp.eq.s32.totalorder %s2304_s16, 3  ;;  %s51_s26 = sor.u32 %s50_s21, %s49_s25 }
  0x24   : > { %2774 = sst [smem:[#allocation35_spill]] %s2773_s24  ;;  %p216_p10 = scmp.eq.s32.totalorder %s49_s25, 0 }
  0x25   : > { %p52_p11 = scmp.eq.s32.totalorder %s51_s26, 0  ;;  %p2338_p12 = por %p229_p9, %p228_p8 }
  0x26   : > { %s2343_s18 = scalar_select %p216_p10, %s2150_s29, %s218_s23  }
  0x27   : > { %s2775_s30 = scalar_select %p2338_p12, 1, 0 }
  0x28   : > { %2777 = sst [smem:[#allocation37_spill]] %s2343_s18  ;;  %p234_p13 = scmp.ne.s32.totalorder %s2146_s28, %s2142_s27 }
  0x29   : > { %2776 = sst [smem:[#allocation36_spill]] %s2775_s30  ;;  %p235_p0 = scmp.eq.s32.totalorder %s1489_s17, 3 }
  0x2a   : > { %s2346_s8 = scalar_select %p52_p11, %s2162_s10, %s54_s20  }
  0x2b   : > { %p1490_p1 = scmp.ge.s32.totalorder %s2182_s15, 1  ;;  %p268_p2 = scmp.lt.s32.totalorder %s2182_s15, 5 }
  0x2c   : > { %2778 = sst [smem:[#allocation38_spill]] %s2346_s8  ;;  %p2352_p4 = por %p235_p0, %p234_p13 }
  0x2d   : > { %p2356_p5 = pnand %p1490_p1, %p268_p2  ;;  %s2184_s25 = smov [#allocation9]  }
  0x2e   : > { %s2779_s7 = scalar_select %p2352_p4, 1, 0 }
  0x2f   : > { %s2781_s21 = scalar_select %p2356_p5, 1, 0 }
  0x30   : > { %2780 = sst [smem:[#allocation39_spill]] %s2779_s7  ;;  %p1704_p8 = pneg %p2356_p5 }
  0x31   : > { %s293_s23 = sshll.u32 %s2184_s25, 4  ;;  %s1872_s19 = scalar_lea.hbm %s2735_s4, 1024  ;;  %s294_s23 = int_to_ptr.vmem [resolvable:$true] %s293_s23 }
  0x32   : > { %p2364_p9 = pnand %p1704_p8, %p2746_p6  ;;  %p1873_p10 = scmp.ne.s32.totalorder %s2735_s4, %s1872_s19 }
  0x33   : > { %p1879_p1 = scmp.lt.u32.totalorder %s1872_s19, %s2735_s4 }
  0x34   : > { %p2376_p11 = pneg %p2364_p9 }
  0x36   : > { %p1875_p13 = pnand %p2376_p11, %p1873_p10 }
  0x38   : > { %p1876_p0 = pneg %p1875_p13 }
  0x3a   : > { %p1881_p2 = pnand %p1879_p1, %p1876_p0 }
  0x3c   : > { %1884 = shalt.err (!%p1881_p2)
}
  0x3d   : > { %s1885_s17 = scalar_lea.vmem %s294_s23, 1024  ;;  %p1893_p12 = scmp.lt.s32.totalorder %s294_s23, %s294_s23 }
  0x3e   : > { %p1886_p8 = scmp.ne.s32.totalorder %s294_s23, %s1885_s17  ;;  %p1894_p7 = scmp.lt.s32.totalorder %s1885_s17, %s1885_s17 }
  0x40   : > { %p1888_p6 = pnand %p1886_p8, %p2376_p11  ;;  %p1895_p5 = por %p1894_p7, %p1893_p12 }
  0x42   : > { %p1889_p4 = pneg %p1888_p6 }
  0x44   : > { %p1896_p3 = pnand %p1895_p5, %p1889_p4 }
  0x46   : > { %1899 = shalt.err (!%p1896_p3)
}
  0x47   : > { %s2185_s8 = smov 64   ;;  %s2186_s18 = smov 4  }
  0x48   : > { %1710 = dma.hbm_to_vmem [thread:$0]  (!%p2364_p9), %s2735_s4, 1024, %s294_s23, [#allocation10], %s2185_s8, %s2185_s8, %s2186_s18  }
  0x49   : > { %s2187_s26 = smov [#allocation8]   ;;  %s2188_s27 = smov [#allocation11]  }
  0x4a   : > { %s280_s25 = sshll.u32 %s2187_s26, 4  ;;  %s306_s17 = sshll.u32 %s2188_s27, 4  ;;  %s281_s25 = int_to_ptr.vmem [resolvable:$true] %s280_s25  ;;  %s307_s17 = int_to_ptr.vmem [resolvable:$true] %s306_s17 }
  0x4b   : > { %s1900_s2 = scalar_lea.hbm %s2734_s3, 1024 }
  0x4c   : > { %p1901_p3 = scmp.ne.s32.totalorder %s2734_s3, %s1900_s2  ;;  %p1907_p12 = scmp.lt.u32.totalorder %s1900_s2, %s2734_s3 }
  0x4e   : > { %p1903_p6 = pnand %p1901_p3, %p2376_p11 }
  0x50   : > { %p1904_p7 = pneg %p1903_p6 }
  0x52   : > { %p1909_p4 = pnand %p1907_p12, %p1904_p7 }
  0x54   : > { %1912 = shalt.err (!%p1909_p4)
}
  0x55   : > { %s1913_s23 = scalar_lea.vmem %s281_s25, 1024  ;;  %p1921_p0 = scmp.lt.s32.totalorder %s281_s25, %s281_s25 }
  0x56   : > { %p1914_p5 = scmp.ne.s32.totalorder %s281_s25, %s1913_s23  ;;  %p1922_p1 = scmp.lt.s32.totalorder %s1913_s23, %s1913_s23 }
  0x58   : > { %p1916_p10 = pnand %p1914_p5, %p2376_p11  ;;  %p1923_p2 = por %p1922_p1, %p1921_p0 }
  0x5a   : > { %p1917_p13 = pneg %p1916_p10 }
  0x5c   : > { %p1924_p8 = pnand %p1923_p2, %p1917_p13 }
  0x5e   : > { %1927 = shalt.err (!%p1924_p8)
}
  0x5f   : > { %1707 = dma.hbm_to_vmem [thread:$0]  (!%p2364_p9), %s2734_s3, 1024, %s281_s25, [#allocation7], %s2185_s8, %s2185_s8, %s2186_s18  }
  0x60   : > { %s1928_s12 = scalar_lea.hbm %s2736_s5, 1024 }
  0x61   : > { %p1929_p3 = scmp.ne.s32.totalorder %s2736_s5, %s1928_s12  ;;  %p1935_p12 = scmp.lt.u32.totalorder %s1928_s12, %s2736_s5 }
  0x63   : > { %p1931_p6 = pnand %p1929_p3, %p2376_p11 }
  0x65   : > { %p1932_p7 = pneg %p1931_p6 }
  0x67   : > { %p1937_p4 = pnand %p1935_p12, %p1932_p7 }
  0x69   : > { %1940 = shalt.err (!%p1937_p4)
}
  0x6a   : > { %s1941_s19 = scalar_lea.vmem %s307_s17, 1024  ;;  %p1949_p0 = scmp.lt.s32.totalorder %s307_s17, %s307_s17 }
  0x6b   : > { %p1942_p5 = scmp.ne.s32.totalorder %s307_s17, %s1941_s19  ;;  %p1950_p1 = scmp.lt.s32.totalorder %s1941_s19, %s1941_s19 }
  0x6d   : > { %p1944_p10 = pnand %p1942_p5, %p2376_p11  ;;  %p1951_p2 = por %p1950_p1, %p1949_p0 }
  0x6f   : > { %p1945_p13 = pneg %p1944_p10 }
  0x71   : > { %p1952_p8 = pnand %p1951_p2, %p1945_p13 }
  0x73   : > { %1955 = shalt.err (!%p1952_p8)
}
  0x74   : > { %1713 = dma.hbm_to_vmem [thread:$0]  (!%p2364_p9), %s2736_s5, 1024, %s307_s17, [#allocation10], %s2185_s8, %s2185_s8, %s2186_s18  }
  0x75   : > { %s2189_s23 = smov [#allocation12]   ;;  %s1956_s11 = scalar_lea.hbm %s2737_s6, 1024 }
  0x76   : > { %s319_s27 = sshll.u32 %s2189_s23, 4  ;;  %p1957_p3 = scmp.ne.s32.totalorder %s2737_s6, %s1956_s11  ;;  %s320_s27 = int_to_ptr.vmem [resolvable:$true] %s319_s27 }
  0x77   : > { %p1963_p12 = scmp.lt.u32.totalorder %s1956_s11, %s2737_s6 }
  0x78   : > { %p1959_p6 = pnand %p1957_p3, %p2376_p11 }
  0x7a   : > { %p1960_p7 = pneg %p1959_p6 }
  0x7c   : > { %p1965_p4 = pnand %p1963_p12, %p1960_p7 }
  0x7e   : > { %1968 = shalt.err (!%p1965_p4)
}
  0x7f   : > { %s1969_s17 = scalar_lea.vmem %s320_s27, 1024  ;;  %p1977_p0 = scmp.lt.s32.totalorder %s320_s27, %s320_s27 }
  0x80   : > { %p1970_p5 = scmp.ne.s32.totalorder %s320_s27, %s1969_s17  ;;  %p1978_p1 = scmp.lt.s32.totalorder %s1969_s17, %s1969_s17 }
  0x82   : > { %p1972_p10 = pnand %p1970_p5, %p2376_p11  ;;  %p1979_p2 = por %p1978_p1, %p1977_p0 }
  0x84   : > { %p1973_p13 = pneg %p1972_p10 }
  0x86   : > { %p1980_p8 = pnand %p1979_p2, %p1973_p13 }
  0x88   : > { %1983 = shalt.err (!%p1980_p8)
}
  0x89   : > { %1716 = dma.hbm_to_vmem [thread:$0]  (!%p2364_p9), %s2737_s6, 1024, %s320_s27, [#allocation13], %s2185_s8, %s2185_s8, %s2186_s18  }
  0x8a   : > { %p1495_p3 = scmp.ge.s32.totalorder %s2182_s15, 4 }
  0x8c   : > { %329 = sbr.rel (%p1495_p3) target bundleno = 188 (0xbc), region = 32 }
  0x93   : > { %s2460_s29 = sand.u32 1, %s2162_s10   ;;  %s1498_s20 = sshll.u32 %s2174_s13, 1 }
  0x94   : > { %s1496_s26 = sshll.u32 %s2460_s29, 6  ;;  %s1556_s25 = sshll.u32 %s2178_s14, 5 }
  0x95   : > { %s344_s8 = sadd.s32 %s1556_s25, %s1498_s20  ;;  %s337_s18 = scalar_lea.vmem [#allocation3], %s1496_s26 }
  0x96   : > { %s359_s23 = sshll.u32 %s337_s18, 4  ;;  %s1500_s27 = sshll.u32 %s344_s8, 6  ;;  %s360_s23 = int_to_ptr.vmem [resolvable:$true] %s359_s23 }
  0x97   : > { %p2784_p9 = scmp.ne.s32.totalorder %s2771_s22, 0  ;;  %s2190_s28 = smov 256  }
  0x98   : > { %s2191_s12 = smov 128   ;;  %s2192_s16 = smov 2  }
  0x99   : > { %s1681_s2 = scalar_select %p2784_p9, [#allocation0], [#allocation19] }
  0x9a   : > { %1682 = sst [smem:[#allocation18]] (%p2784_p9), %s2190_s28  ;;  %s2193_s24 = smov 64  }
  0x9b   : > { %s351_s11 = sld [smem:[%s1681_s2]]   ;;  %s346_s7 = scalar_lea.hbm %s2731_s0, %s1500_s27 }
  0x9c   : > { %1683 = sst [smem:[#allocation18 + $0x1]] (%p2784_p9), %s2191_s12  ;;  %s2194_s19 = smov 4  }
  0x9d   : > { %1684 = sst [smem:[#allocation18 + $0x2]] (%p2784_p9), %s2192_s16  ;;  %s334_s8 = scalar_lea.sflag [#allocation4], %s2460_s29 }
  0x9e   : > { %1685 = sst [smem:[#allocation18 + $0x3]] (%p2784_p9), %s2193_s24  ;;  %s2195_s18 = smov [#allocation17]  }
  0x9f   : > { %1686 = sst [smem:[#allocation18 + $0x4]] (%p2784_p9), %s2193_s24  ;;  %s382_s2 = sand.u32 1, %s2182_s15  }
  0xa0   : > { %1687 = sst [smem:[#allocation18 + $0x5]] (%p2784_p9), %s2194_s19  ;;  %s1503_s28 = sshll.u32 %s2460_s29, 3 }
  0xa1   : > { %s1501_s26 = sshll.u32 %s351_s11, 26  ;;  %s391_s27 = sadd.s32 %s2178_s14, %s1498_s20 }
  0xa2   : > { %s1502_s25 = sadd.s32 134217728, %s1501_s26  ;;  %s386_s12 = scalar_lea.vmem [#allocation6], %s1503_s28 }
  0xa3   : > { %1688 = dma.general (%p2784_p9), %s346_s7, 1024, %s360_s23, %s334_s8, %s2195_s18, [#allocation18], %s1502_s25, 0  }
  0xa4   : > { %s395_s16 = sshll.u32 %s386_s12, 4  ;;  %s1505_s24 = sshll.u32 %s391_s27, 7  ;;  %s2492_s16 = int_to_ptr.vmem [resolvable:$true] %s395_s16 }
  0xa5   : > { %s393_s17 = scalar_lea.hbm %s2732_s1, %s1505_s24  ;;  %s383_s19 = scalar_lea.sflag [#allocation7], %s382_s2 }
  0xa6   : > { %s1984_s23 = scalar_lea.hbm %s393_s17, 128  ;;  %s1988_s29 = scalar_lea.hbm %s2732_s1, 512 }
  0xa7   : > { %p1985_p11 = scmp.ne.s32.totalorder %s393_s17, %s1984_s23  ;;  %p1989_p12 = scmp.lt.u32.totalorder %s393_s17, %s2732_s1 }
  0xa8   : > { %p1990_p4 = scmp.lt.u32.totalorder %s1988_s29, %s1984_s23  ;;  %p1992_p10 = scmp.lt.u32.totalorder %s1984_s23, %s393_s17 }
  0xa9   : > { %p1986_p6 = pnand %p1985_p11, %p2784_p9 }
  0xaa   : > { %p1991_p5 = por %p1990_p4, %p1989_p12 }
  0xab   : > { %p1987_p7 = pneg %p1986_p6 }
  0xac   : > { %p1993_p13 = por %p1992_p10, %p1991_p5 }
  0xae   : > { %p1994_p0 = pnand %p1993_p13, %p1987_p7 }
  0xb0   : > { %1997 = shalt.err (!%p1994_p0)
}
  0xb1   : > { %s1998_s8 = scalar_lea.vmem %s2492_s16, 128  ;;  %s2196_s18 = smov [#allocation6]  }
  0xb2   : > { %p1999_p1 = scmp.ne.s32.totalorder %s2492_s16, %s1998_s8  ;;  %s2002_s2 = sshll.u32 %s2196_s18, 4  ;;  %s2003_s2 = int_to_ptr.vmem [resolvable:$false] %s2002_s2 }
  0xb3   : > { %s2004_s28 = scalar_lea.vmem %s2003_s2, 256  ;;  %p2005_p3 = scmp.lt.s32.totalorder %s2492_s16, %s2003_s2 }
  0xb4   : > { %p2000_p2 = pnand %p1999_p1, %p2784_p9  ;;  %p2006_p11 = scmp.lt.s32.totalorder %s2004_s28, %s1998_s8 }
  0xb6   : > { %p2001_p8 = pneg %p2000_p2  ;;  %p2007_p6 = por %p2006_p11, %p2005_p3 }
  0xb8   : > { %p2008_p12 = pnand %p2007_p6, %p2001_p8 }
  0xba   : > { %2011 = shalt.err (!%p2008_p12)
}
  0xbb   : > { %1689 = dma.hbm_to_vmem [thread:$0]  (%p2784_p9), %s393_s17, 128, %s2492_s16, %s383_s19  }
  0xbc PF: > { %p2785_p7 = scmp.ne.s32.totalorder %s2781_s21, 0 }
  0xbd   : > { %s2786_s27 = sld [smem:[#allocation35_spill]] (!%p2785_p7)  ;;  %s413_s12 = sand.u32 (!%p2785_p7), 1, %s2158_s9  }
  0xbe   : > { %411 = sbr.rel (%p2785_p7) target bundleno = 1028 (0x404), region = 48  ;;  %s1507_s24 = sshll.u32 (!%p2785_p7), %s413_s12, 6 }
  0xbf   : > { %s414_s11 = scalar_lea.sflag (!%p2785_p7), [#allocation4], %s413_s12  ;;  %s2516_s30 = scalar_lea.vmem (!%p2785_p7), [#allocation3], %s1507_s24 }
  0xc3   : > { %p2787_p4 = scmp.ne.s32.totalorder (!%p2785_p7), %s2786_s27, 0 }
  0xc5   : > { %2113 = dma.done.wait (%p2787_p4), %s414_s11, 1024  }
  0xc6   : > { %2115 = vsyncadd (%p2787_p4), %s414_s11, 4294966272  ;;  %s2788_s23 = sld [smem:[#allocation32_spill]]  ;;  %s1508_s16 = sshll.u32 %s413_s12, 3 }
  0xc7   : > { %s426_s19 = scalar_lea.vmem [#allocation6], %s1508_s16 }
  0xcc   : > { %s422_s22 = sand.u32 1, %s2788_s23  }
  0xcd   : > { %s423_s17 = scalar_lea.sflag [#allocation7], %s422_s22 }
  0xce   : > { %2117 = dma.done.wait (%p2787_p4), %s423_s17, 128  }
  0xcf   : > { %2119 = vsyncadd (%p2787_p4), %s423_s17, 4294967168  ;;  %p2789_p9 = scmp.eq.s32.totalorder %s2788_s23, 0 }
  0xd1   : > { %2121 = dma.done.wait (%p2789_p9), [#allocation7], 1024   ;;  %p2790_p5 = pmov %p2789_p9 }
  0xd3   : > { %2123 = vsyncadd (%p2790_p5), [#allocation7], 4294966272  ;;  %p2791_p10 = pmov %p2790_p5 }
  0xd4   : > { %p2792_p13 = pmov %p2790_p5 }
  0xd5   : > { %2125 = dma.done.wait (%p2791_p10), [#allocation10], 2048  }
  0xd6   : > { %2127 = vsyncadd (%p2792_p13), [#allocation10], 4294965248  ;;  %p2793_p0 = pmov %p2790_p5 }
  0xd8   : > { %2129 = dma.done.wait (%p2793_p0), [#allocation13], 1024   ;;  %p2794_p1 = pmov %p2793_p0 }
  0xd9   : > { %s2795_s21 = sld [smem:[#allocation28_spill]]  ;;  %s2797_s18 = sld [smem:[#allocation40_spill]] }
  0xda   : > { %2131 = vsyncadd (%p2794_p1), [#allocation13], 4294966272  ;;  %s2796_s7 = sld [smem:[#allocation31_spill]]  ;;  %s2798_s12 = sld [smem:[#allocation30_spill]] }
  0xdf   : > { %s2540_s26 = sand.u32 1, %s2795_s21  }
  0xe0   : > { %p491_p2 = scmp.lt.s32.totalorder %s2796_s7, 1  ;;  %s1513_s29 = sshll.u32 %s2540_s26, 3 }
  0xe1   : > { %s2550_s28 = scalar_lea.vmem [#allocation14], %s1513_s29  ;;  %s2552_s27 = scalar_lea.vmem [#allocation15], %s1513_s29 }
  0xe2   : > { %s2828_s7 = smov (!%p491_p2, %s2796_s7), 1  ;;  %p1516_p8 = scmp.ne.s32.totalorder %s2798_s12, 0 }
  0xe3   : > { %s1515_s20 = sshll.u32 %s2828_s7, 3  ;;  %v2197_v0 = vmov (!%p1516_p8), 0.0  }
  0xe4   : > { %s2548_s2 = scalar_lea.vmem %s2797_s18, %s1515_s20  ;;  %499 = sbr.rel (%p1516_p8) target bundleno = 235 (0xeb), region = 76  ;;  %500 = vst [vmem:[#allocation2] sm:$0xff] (!%p1516_p8), %v2197_v0 }
  0xeb PF: > { %v501_v1 = vld [vmem:[%s426_s19] sm:$0xff]  ;;  %v523_v2 = vlaneseq  ;;  %v2198_v20 = vmov 839922192   ;;  %v2199_v22 = vmov 1985246804   ;;  %vm814_vm0 = vcmask 1041409  }
  0xec   : > { %v502_v3 = vpack.c.bf16 %v501_v1, %v501_v1  ;;  %v591_v21 = vunpack.c.l.s4 %v2198_v20  ;;  %v598_v23 = vunpack.c.l.s4 %v2199_v22  ;;  %v508_v28 = vld [vmem:[%s2516_s30 + $0x10] sm:$0xf]  ;;  %v509_v29 = vld [vmem:[%s2516_s30 + $0x14] sm:$0xf]  ;;  %v504_v31 = vld [vmem:[%s2516_s30] sm:$0xf] }
  0xed   : > { %v524_v4 = vshrl.u32 %v523_v2, 7  ;;  %v505_v32 = vld [vmem:[%s2516_s30 + $0x4] sm:$0xf]  ;;  %v510_v42 = vld [vmem:[%s2516_s30 + $0x18] sm:$0xf]  ;;  %vm816_vm1 = vcmask 1042434  }
  0xee   : > { %v521_v5 = vpack.i.b16 %v502_v3, %v502_v3  ;;  %v530_v6 = vshrl.u32 %v502_v3, 16  ;;  %v592_v24 = vunpack.c.0.s8 %v591_v21  ;;  %v599_v25 = vunpack.c.0.s8 %v598_v23  ;;  %v511_v49 = vld [vmem:[%s2516_s30 + $0x1c] sm:$0xf]  ;;  %v506_v50 = vld [vmem:[%s2516_s30 + $0x8] sm:$0xf]  ;;  %s2799_s24 = sld [smem:[#allocation30_spill]] }
  0xef   : > { %v542_v7 = vsub.s32 1, %v524_v4  ;;  %v525_v8 = vsub.s32 0, %v524_v4  ;;  %v556_v14 = vsub.s32 2, %v524_v4  ;;  %v570_v17 = vsub.s32 3, %v524_v4  ;;  %v507_v51 = vld [vmem:[%s2516_s30 + $0xc] sm:$0xf] }
  0xf0   : > { %v531_v9 = vpack.i.b16 %v530_v6, %v530_v6  ;;  %v2555_v26 = vsub.s32 %v592_v24, %v524_v4  ;;  %v2557_v27 = vsub.s32 %v599_v25, %v524_v4  ;;  %v514_v62 = vld [vmem:[%s2516_s30 + $0x28] sm:$0xf]  ;;  %v515_v63 = vld [vmem:[%s2516_s30 + $0x2c] sm:$0xf]  ;;  %vm818_vm2 = vcmask 1043459  }
  0xf1   : > { %v543_v10 = vrot.slane %v521_v5, %v542_v7  ;;  %v526_v11 = vrot.slane %v521_v5, %v525_v8  ;;  %v557_v16 = vrot.slane %v521_v5, %v556_v14  ;;  %v571_v19 = vrot.slane %v521_v5, %v570_v17 }
  0xf2   : > { %v550_v12 = vrot.slane %v531_v9, %v542_v7  ;;  %v536_v13 = vrot.slane %v531_v9, %v525_v8  ;;  %v564_v15 = vrot.slane %v531_v9, %v556_v14  ;;  %v578_v18 = vrot.slane %v531_v9, %v570_v17  ;;  %v513_v14 = vld [vmem:[%s2516_s30 + $0x24] sm:$0xf] }
  0xf3   : > { %545 = vbcast.lane.c.b16.xlu1 %v543_v10, 256  ;;  %528 = vbcast.lane.c.b16.xlu0 %v526_v11, 256  ;;  %vm820_vm3 = vcmask 1044484   ;;  %vm822_vm4 = vcmask 1045509   ;;  %vm824_vm5 = vcmask 1046534   ;;  %vm826_vm6 = vcmask 1047559  }
  0xf4   : > { %p1517_p3 = scmp.ne.s32.totalorder %s2799_s24, 1 }
  0xf5   : > { %vm2202_vm7 = vmmov (!%p1517_p3), 0  }
  0xf7   : > { %552 = vbcast.lane.c.b16.xlu1 %v550_v12, 256  ;;  %538 = vbcast.lane.c.b16.xlu0 %v536_v13, 256  ;;  %v512_v13 = vld [vmem:[%s2516_s30 + $0x20] sm:$0xf] }
  0xfb   : > { %566 = vbcast.lane.c.b16.xlu1 %v564_v15, 256  ;;  %559 = vbcast.lane.c.b16.xlu0 %v557_v16, 256 }
  0xff   : > { %580 = vbcast.lane.c.b16.xlu1 %v578_v18, 256  ;;  %573 = vbcast.lane.c.b16.xlu0 %v571_v19, 256 }
 0x165   : > { %v546_v30 = vpop.permute.xlu1 %545  ;;  %v529_v33 = vpop.permute.xlu0 %528 }
 0x166   : > { %v624_v34 = vrot.slane %v546_v30, %v2555_v26  ;;  %v631_v35 = vrot.slane %v546_v30, %v2557_v27  ;;  %v596_v36 = vrot.slane %v529_v33, %v2555_v26  ;;  %v603_v37 = vrot.slane %v529_v33, %v2557_v27 }
 0x168   : > { %v722_v38 = vmul.bf16 %v624_v34, %v508_v28  ;;  %v723_v39 = vmul.bf16 %v631_v35, %v509_v29  ;;  %v718_v40 = vmul.bf16 %v596_v36, %v504_v31  ;;  %v719_v41 = vmul.bf16 %v603_v37, %v505_v32  ;;  %v518_v31 = vld [vmem:[%s2516_s30 + $0x38] sm:$0xf]  ;;  %v519_v37 = vld [vmem:[%s2516_s30 + $0x3c] sm:$0xf] }
 0x169   : > { %v553_v43 = vpop.permute.xlu1 %552  ;;  %v539_v44 = vpop.permute.xlu0 %538 }
 0x16a   : > { %v738_v45 = vunpack.c.l.bf16 %v722_v38  ;;  %v739_v46 = vunpack.c.l.bf16 %v723_v39  ;;  %v734_v47 = vunpack.c.l.bf16 %v718_v40  ;;  %v735_v48 = vunpack.c.l.bf16 %v719_v41 }
 0x16b   : > { %v638_v52 = vrot.slane %v553_v43, %v2555_v26  ;;  %v645_v53 = vrot.slane %v553_v43, %v2557_v27  ;;  %v610_v54 = vrot.slane %v539_v44, %v2555_v26  ;;  %v617_v55 = vrot.slane %v539_v44, %v2557_v27 }
 0x16c   : > { %v764_v56 = vadd.f32 %v739_v46, %v738_v45  ;;  %v750_v57 = vadd.f32 %v735_v48, %v734_v47 }
 0x16d   : > { %v724_v58 = vmul.bf16 %v638_v52, %v510_v42  ;;  %v725_v59 = vmul.bf16 %v645_v53, %v511_v49  ;;  %v720_v60 = vmul.bf16 %v610_v54, %v506_v50  ;;  %v721_v61 = vmul.bf16 %v617_v55, %v507_v51  ;;  %v567_v0 = vpop.permute.xlu1 %566  ;;  %v560_v5 = vpop.permute.xlu0 %559  ;;  %v516_v52 = vld [vmem:[%s2516_s30 + $0x30] sm:$0xf]  ;;  %v517_v53 = vld [vmem:[%s2516_s30 + $0x34] sm:$0xf] }
 0x16e   : > { %v765_v1 = vrot.slane %v764_v56, 4  ;;  %v751_v2 = vrot.slane %v750_v57, 4  ;;  %v666_v3 = vrot.slane %v567_v0, %v2555_v26  ;;  %v673_v4 = vrot.slane %v567_v0, %v2557_v27 }
 0x16f   : > { %v740_v6 = vunpack.c.l.bf16 %v724_v58  ;;  %v741_v7 = vunpack.c.l.bf16 %v725_v59  ;;  %v736_v8 = vunpack.c.l.bf16 %v720_v60  ;;  %v737_v9 = vunpack.c.l.bf16 %v721_v61 }
 0x170   : > { %v752_v10 = vadd.f32 %v751_v2, %v750_v57  ;;  %v728_v11 = vmul.bf16 %v666_v3, %v514_v62  ;;  %v729_v12 = vmul.bf16 %v673_v4, %v515_v63  ;;  %v652_v17 = vrot.slane %v560_v5, %v2555_v26 }
 0x171   : > { %v771_v15 = vadd.f32 %v741_v7, %v740_v6  ;;  %v757_v16 = vadd.f32 %v737_v9, %v736_v8  ;;  %v659_v18 = vrot.slane %v560_v5, %v2557_v27  ;;  %v581_v19 = vpop.permute.xlu1 %580  ;;  %v766_v20 = vadd.f32 %v765_v1, %v764_v56  ;;  %v574_v45 = vpop.permute.xlu0 %573 }
 0x172   : > { %v753_v21 = vrot.slane %v752_v10, 2  ;;  %v744_v22 = vunpack.c.l.bf16 %v728_v11  ;;  %v745_v23 = vunpack.c.l.bf16 %v729_v12  ;;  %v726_v28 = vmul.bf16 %v652_v17, %v512_v13 }
 0x173   : > { %v772_v24 = vrot.slane %v771_v15, 4  ;;  %v758_v25 = vrot.slane %v757_v16, 4  ;;  %v727_v29 = vmul.bf16 %v659_v18, %v513_v14  ;;  %v694_v32 = vrot.slane %v581_v19, %v2555_v26 }
 0x174   : > { %v785_v30 = vadd.f32 %v745_v23, %v744_v22  ;;  %v742_v35 = vunpack.c.l.bf16 %v726_v28  ;;  %v767_v38 = vrot.slane %v766_v20, 2  ;;  %v701_v40 = vrot.slane %v581_v19, %v2557_v27 }
 0x175   : > { %v773_v33 = vadd.f32 %v772_v24, %v771_v15  ;;  %v759_v34 = vadd.f32 %v758_v25, %v757_v16  ;;  %v743_v36 = vunpack.c.l.bf16 %v727_v29  ;;  %v754_v41 = vadd.f32 %v753_v21, %v752_v10 }
 0x176   : > { %v786_v39 = vrot.slane %v785_v30, 4  ;;  %v732_v44 = vmul.bf16 %v694_v32, %v518_v31  ;;  %v733_v47 = vmul.bf16 %v701_v40, %v519_v37  ;;  %v768_v54 = vadd.f32 %v767_v38, %v766_v20  ;;  %v1840_v40 = vld [vmem:[#allocation8] sm:$0xff] (!%p1517_p3)  }
 0x177   : > { %v760_v42 = vrot.slane %v759_v34, 2  ;;  %v778_v43 = vadd.f32 %v743_v36, %v742_v35  ;;  %v774_v46 = vrot.slane %v773_v33, 2  ;;  %v680_v56 = vrot.slane %v574_v45, %v2555_v26 }
 0x178   : > { %v787_v49 = vadd.f32 %v786_v39, %v785_v30  ;;  %v748_v51 = vunpack.c.l.bf16 %v732_v44  ;;  %v749_v55 = vunpack.c.l.bf16 %v733_v47  ;;  %v687_v57 = vrot.slane %v574_v45, %v2557_v27  ;;  %v836_v39 = vld [vmem:[%s2548_s2] sm:$0xff] (!%p1517_p3)  ;;  %v1842_v44 = vld [vmem:[#allocation8 + $0x10] sm:$0xff] (!%p1517_p3)   ;;  %v1843_v45 = vld [vmem:[#allocation8 + $0x18] sm:$0xff] (!%p1517_p3)  }
 0x179   : > { %v761_v48 = vadd.f32 %v760_v42, %v759_v34  ;;  %v779_v50 = vrot.slane %v778_v43, 4  ;;  %v755_v58 = vrot.slane %v754_v41, 1  ;;  %v730_v62 = vmul.bf16 %v680_v56, %v516_v52  ;;  %v503_v34 = vld [vmem:[#allocation2] sm:$0xff]  ;;  %v1858_v52 = vld [vmem:[#allocation9 + $0x10] sm:$0xff] (!%p1517_p3)  }
 0x17a   : > { %v799_v61 = vadd.f32 %v749_v55, %v748_v51  ;;  %v731_v63 = vmul.bf16 %v687_v57, %v517_v53  ;;  %v775_v0 = vadd.f32 %v774_v46, %v773_v33  ;;  %v788_v2 = vrot.slane %v787_v49, 2  ;;  %v1844_v46 = vld [vmem:[#allocation8 + $0x20] sm:$0xff] (!%p1517_p3)   ;;  %v1845_v47 = vld [vmem:[#allocation8 + $0x28] sm:$0xff] (!%p1517_p3)   ;;  %v1859_v53 = vld [vmem:[#allocation9 + $0x18] sm:$0xff] (!%p1517_p3)  }
 0x17b   : > { %v762_v59 = vrot.slane %v761_v48, 1  ;;  %v780_v60 = vadd.f32 %v779_v50, %v778_v43  ;;  %v769_v4 = vrot.slane %v768_v54, 1  ;;  %v746_v6 = vunpack.c.l.bf16 %v730_v62  ;;  %v1841_v43 = vld [vmem:[#allocation8 + $0x8] sm:$0xff] (!%p1517_p3)   ;;  %v1856_v50 = vld [vmem:[#allocation9] sm:$0xff] (!%p1517_p3)   ;;  %v1862_v56 = vld [vmem:[#allocation9 + $0x30] sm:$0xff] (!%p1517_p3)  }
 0x17c   : > { %v800_v5 = vrot.slane %v799_v61, 4  ;;  %v747_v7 = vunpack.c.l.bf16 %v731_v63  ;;  %v756_v8 = vadd.f32 %v755_v58, %v754_v41  ;;  %v776_v27 = vrot.slane %v775_v0, 1  ;;  %v1857_v51 = vld [vmem:[#allocation9 + $0x8] sm:$0xff] (!%p1517_p3)   ;;  %v1863_v57 = vld [vmem:[#allocation9 + $0x38] sm:$0xff] (!%p1517_p3)  }
 0x17d   : > { %v763_v1 = vadd.f32 %v762_v59, %v761_v48  ;;  %v781_v3 = vrot.slane %v780_v60, 2  ;;  %v789_v12 = vadd.f32 %v788_v2, %v787_v49  ;;  %v770_v13 = vadd.f32 %v769_v4, %v768_v54  ;;  %v1846_v48 = vld [vmem:[#allocation8 + $0x30] sm:$0xff] (!%p1517_p3)   ;;  %v1847_v49 = vld [vmem:[#allocation8 + $0x38] sm:$0xff] (!%p1517_p3)   ;;  %v1860_v54 = vld [vmem:[#allocation9 + $0x20] sm:$0xff] (!%p1517_p3)  }
 0x17e   : > { %v801_v26 = vadd.f32 %v800_v5, %v799_v61  ;;  %v792_v10 = vadd.f32 %v747_v7, %v746_v6  ;;  %v777_v20 = vadd.f32 %v776_v27, %v775_v0  ;;  %v2200_v41 = vmov (!%p1517_p3), 0   ;;  %v1861_v55 = vld [vmem:[#allocation9 + $0x28] sm:$0xff] (!%p1517_p3)   ;;  %v1848_v61 = vld [vmem:[#allocation11] sm:$0xff] (!%p1517_p3)   ;;  %v1850_v0 = vld [vmem:[#allocation11 + $0x10] sm:$0xff] (!%p1517_p3)  }
 0x17f   : > { %v782_v9 = vadd.f32 %v781_v3, %v780_v60  ;;  %v815_v11 = vsel %vm814_vm0, %v763_v1, %v756_v8  ;;  %v790_v21 = vrot.slane %v789_v12, 1  ;;  %1839 = vset.pattern.permute.xlu0 (!%p1517_p3), %v2200_v41  ;;  %v2201_v42 = vmov (!%p1517_p3), 0.0   ;;  %v1849_v63 = vld [vmem:[#allocation11 + $0x8] sm:$0xff] (!%p1517_p3)   ;;  %v1851_v1 = vld [vmem:[#allocation11 + $0x18] sm:$0xff] (!%p1517_p3)   ;;  %v1852_v2 = vld [vmem:[#allocation11 + $0x20] sm:$0xff] (!%p1517_p3)  }
 0x180   : > { %v802_v15 = vrot.slane %v801_v26, 2  ;;  %v793_v16 = vrot.slane %v792_v10, 4  ;;  %v817_v17 = vsel %vm816_vm1, %v770_v13, %v815_v11  ;;  %1593 = vmatprep.subr.bf16.mxu0 (!%p1517_p3), %v2201_v42  ;;  %839 = vperm.xlu0 (!%p1517_p3), %1839, %v836_v39   ;;  %v1853_v3 = vld [vmem:[#allocation11 + $0x28] sm:$0xff] (!%p1517_p3)   ;;  %v1854_v4 = vld [vmem:[#allocation11 + $0x30] sm:$0xff] (!%p1517_p3)   ;;  %v1855_v5 = vld [vmem:[#allocation11 + $0x38] sm:$0xff] (!%p1517_p3)  }
 0x181   : > { %v783_v14 = vrot.slane %v782_v9, 1  ;;  %v819_v24 = vsel %vm818_vm2, %v777_v20, %v817_v17  ;;  %v791_v29 = vadd.f32 %v790_v21, %v789_v12  ;;  %1594 = vmatpush3.bf16.msra.mxu0 (!%p1517_p3), %v1840_v40  ;;  %1613 = vmatprep.subr.bf16.mxu1 (!%p1517_p3), %v2201_v42  ;;  %v1864_v7 = vld [vmem:[#allocation12] sm:$0xff] (!%p1517_p3)   ;;  %v1865_v27 = vld [vmem:[#allocation12 + $0x8] sm:$0xff] (!%p1517_p3)   ;;  %v1866_v11 = vld [vmem:[#allocation12 + $0x10] sm:$0xff] (!%p1517_p3)  }
 0x182   : > { %v803_v18 = vadd.f32 %v802_v15, %v801_v26  ;;  %v794_v19 = vadd.f32 %v793_v16, %v792_v10  ;;  %1595 = vmatprep.subr.bf16.mxu0 (!%p1517_p3), %v2201_v42  ;;  %1609 = vmatprep.mubr.msk.bf16.mxu0 (!%p1517_p3), %vm2202_vm7, %v2201_v42  ;;  %v1867_v12 = vld [vmem:[#allocation12 + $0x18] sm:$0xff] (!%p1517_p3)   ;;  %v1868_v13 = vld [vmem:[#allocation12 + $0x20] sm:$0xff] (!%p1517_p3)   ;;  %v1870_v15 = vld [vmem:[#allocation12 + $0x30] sm:$0xff] (!%p1517_p3)  }
 0x183   : > { %v784_v22 = vadd.f32 %v783_v14, %v782_v9  ;;  %1629 = vmatprep.mubr.msk.bf16.mxu1 (!%p1517_p3), %vm2202_vm7, %v2201_v42  ;;  %1614 = vmatpush3.bf16.msra.mxu1 (!%p1517_p3), %v1856_v50  ;;  %v1869_v14 = vld [vmem:[#allocation12 + $0x28] sm:$0xff] (!%p1517_p3)   ;;  %v1871_v16 = vld [vmem:[#allocation12 + $0x38] sm:$0xff] (!%p1517_p3)  }
 0x184   : > { %v795_v23 = vrot.slane %v794_v19, 2  ;;  %v804_v25 = vrot.slane %v803_v18, 1  ;;  %1615 = vmatprep.subr.bf16.mxu1 (!%p1517_p3), %v2201_v42 }
 0x185   : > { %v821_v30 = vsel %vm820_vm3, %v784_v22, %v819_v24  ;;  %1596 = vmatpush3.bf16.msra.mxu0 (!%p1517_p3), %v1841_v43 }
 0x186   : > { %v796_v28 = vadd.f32 %v795_v23, %v794_v19  ;;  %v805_v32 = vadd.f32 %v804_v25, %v803_v18  ;;  %v823_v35 = vsel %vm822_vm4, %v791_v29, %v821_v30  ;;  %1597 = vmatprep.subr.bf16.mxu0 (!%p1517_p3), %v2201_v42 }
 0x187   : > { %1616 = vmatpush3.bf16.msra.mxu1 (!%p1517_p3), %v1857_v51 }
 0x188   : > { %v797_v31 = vrot.slane %v796_v28, 1  ;;  %1617 = vmatprep.subr.bf16.mxu1 (!%p1517_p3), %v2201_v42 }
 0x189   : > { %1598 = vmatpush3.bf16.msra.mxu0 (!%p1517_p3), %v1842_v44 }
 0x18a   : > { %v798_v33 = vadd.f32 %v797_v31, %v796_v28  ;;  %834 = sbr.rel (%p1517_p3) target bundleno = 977 (0x3d1), region = 80  ;;  %1599 = vmatprep.subr.bf16.mxu0 (!%p1517_p3), %v2201_v42 }
 0x18b   : > { %1618 = vmatpush3.bf16.msra.mxu1 (!%p1517_p3), %v1858_v52 }
 0x18c   : > { %v825_v36 = vsel %vm824_vm5, %v798_v33, %v823_v35  ;;  %1619 = vmatprep.subr.bf16.mxu1 (!%p1517_p3), %v2201_v42 }
 0x18d   : > { %v827_v37 = vsel %vm826_vm6, %v805_v32, %v825_v36  ;;  %1600 = vmatpush3.bf16.msra.mxu0 (!%p1517_p3), %v1843_v45 }
 0x18e   : > { %v829_v38 = vadd.f32 %v827_v37, %v503_v34  ;;  %1601 = vmatprep.subr.bf16.mxu0 (!%p1517_p3), %v2201_v42 }
 0x18f   : > { %1620 = vmatpush3.bf16.msra.mxu1 (!%p1517_p3), %v1859_v53 }
 0x190   : > { %830 = vst [vmem:[#allocation2] sm:$0xff] %v829_v38  ;;  %1621 = vmatprep.subr.bf16.mxu1 (!%p1517_p3), %v2201_v42 }
 0x191   : > { %1602 = vmatpush3.bf16.msra.mxu0 %v1844_v46 }
 0x192   : > { %1603 = vmatprep.subr.bf16.mxu0 %v2201_v42 }
 0x193   : > { %1622 = vmatpush3.bf16.msra.mxu1 %v1860_v54 }
 0x194   : > { %1623 = vmatprep.subr.bf16.mxu1 %v2201_v42 }
 0x195   : > { %1604 = vmatpush3.bf16.msra.mxu0 %v1845_v47 }
 0x196   : > { %1605 = vmatprep.subr.bf16.mxu0 %v2201_v42 }
 0x197   : > { %1624 = vmatpush3.bf16.msra.mxu1 %v1861_v55  ;;  %v835_v58 = vld [vmem:[#allocation2] sm:$0xff] }
 0x198   : > { %1625 = vmatprep.subr.bf16.mxu1 %v2201_v42 }
 0x199   : > { %1606 = vmatpush3.bf16.msra.mxu0 %v1846_v48 }
 0x19a   : > { %1607 = vmatprep.subr.bf16.mxu0 %v2201_v42 }
 0x19b   : > { %1626 = vmatpush3.bf16.msra.mxu1 %v1862_v56 }
 0x19c   : > { %1627 = vmatprep.subr.bf16.mxu1 %v2201_v42 }
 0x19d   : > { %1608 = vmatpush3.bf16.msra.mxu0 %v1847_v49 }
 0x19e   : > { %1633 = vmatprep.subr.bf16.mxu0 %v2201_v42 }
 0x19f   : > { %1628 = vmatpush3.bf16.msra.mxu1 %v1863_v57 }
 0x1a0   : > { %1653 = vmatprep.subr.bf16.mxu1 %v2201_v42 }
 0x1ff   : > { %v840_v59 = vpop.permute.xlu0 %839 }
 0x200   : > { %v2616_v60 = vmul.f32 %v840_v59, %v835_v58 }
 0x202   : > { %v843_v62 = vpack.c.bf16 %v2616_v60, %v2616_v60 }
 0x204   : > { %1610 = vmatmul.mubr.bf16.vlgmr.msra.gmra.mrb[0].mxu0 %v843_v62 }
 0x205   : > { %1634 = vmatpush3.bf16.msra.mxu0 %v1848_v61  ;;  %1649 = vmatprep.mubr.msk.bf16.mxu0 %vm2202_vm7, %v2201_v42 }
 0x206   : > { %1635 = vmatprep.subr.bf16.mxu0 %v2201_v42 }
 0x209   : > { %1636 = vmatpush3.bf16.msra.mxu0 %v1849_v63 }
 0x20a   : > { %1637 = vmatprep.subr.bf16.mxu0 %v2201_v42 }
 0x20d   : > { %1638 = vmatpush3.bf16.msra.mxu0 %v1850_v0 }
 0x20e   : > { %1639 = vmatprep.subr.bf16.mxu0 %v2201_v42 }
 0x211   : > { %1640 = vmatpush3.bf16.msra.mxu0 %v1851_v1 }
 0x212   : > { %1641 = vmatprep.subr.bf16.mxu0 %v2201_v42 }
 0x215   : > { %1642 = vmatpush3.bf16.msra.mxu0 %v1852_v2 }
 0x216   : > { %1643 = vmatprep.subr.bf16.mxu0 %v2201_v42 }
 0x219   : > { %1644 = vmatpush3.bf16.msra.mxu0 %v1853_v3 }
 0x21a   : > { %1645 = vmatprep.subr.bf16.mxu0 %v2201_v42 }
 0x21d   : > { %1646 = vmatpush3.bf16.msra.mxu0 %v1854_v4 }
 0x21e   : > { %1647 = vmatprep.subr.bf16.mxu0 %v2201_v42 }
 0x221   : > { %1648 = vmatpush3.bf16.msra.mxu0 %v1855_v5 }
 0x224   : > { %1650 = vmatmul.mubr.bf16.vlgmr.msra.gmra.mrb[4].mxu0 %v843_v62 }
 0x2d7   : > { %v942_v6 = vpop.f32.mrb[0].mxu0 }
 0x2d8   : > { %v948_v8 = vpack.c.bf16 %v942_v6, %v942_v6  ;;  %v1611_v9 = vpop.f32.mrb[1].mxu0 }
 0x2d9   : > { %v945_v26 = vpop.f32.mrb[2].mxu0 }
 0x2da   : > { %v1612_v10 = vpop.f32.mrb[3].mxu0  ;;  %1630 = vmatmul.mubr.bf16.vlgmr.msra.gmra.mrb[0].mxu1 %v948_v8 }
 0x2db   : > { %1654 = vmatpush3.bf16.msra.mxu1 %v1864_v7  ;;  %1669 = vmatprep.mubr.msk.bf16.mxu1 %vm2202_vm7, %v2201_v42 }
 0x2dc   : > { %1655 = vmatprep.subr.bf16.mxu1 %v2201_v42 }
 0x2df   : > { %1656 = vmatpush3.bf16.msra.mxu1 %v1865_v27 }
 0x2e0   : > { %1657 = vmatprep.subr.bf16.mxu1 %v2201_v42 }
 0x2e3   : > { %1658 = vmatpush3.bf16.msra.mxu1 %v1866_v11 }
 0x2e4   : > { %1659 = vmatprep.subr.bf16.mxu1 %v2201_v42 }
 0x2e7   : > { %1660 = vmatpush3.bf16.msra.mxu1 %v1867_v12 }
 0x2e8   : > { %1661 = vmatprep.subr.bf16.mxu1 %v2201_v42 }
 0x2eb   : > { %1662 = vmatpush3.bf16.msra.mxu1 %v1868_v13 }
 0x2ec   : > { %1663 = vmatprep.subr.bf16.mxu1 %v2201_v42 }
 0x2ef   : > { %1664 = vmatpush3.bf16.msra.mxu1 %v1869_v14 }
 0x2f0   : > { %1665 = vmatprep.subr.bf16.mxu1 %v2201_v42 }
 0x2f3   : > { %1666 = vmatpush3.bf16.msra.mxu1 %v1870_v15 }
 0x2f4   : > { %1667 = vmatprep.subr.bf16.mxu1 %v2201_v42 }
 0x2f7   : > { %v1153_v17 = vpop.f32.mrb[4].mxu0  ;;  %1668 = vmatpush3.bf16.msra.mxu1 %v1871_v16 }
 0x2f8   : > { %v1651_v18 = vpop.f32.mrb[5].mxu0 }
 0x2f9   : > { %v1156_v19 = vpop.f32.mrb[6].mxu0 }
 0x2fa   : > { %v1652_v20 = vpop.f32.mrb[7].mxu0  ;;  %1670 = vmatmul.mubr.bf16.vlgmr.msra.gmra.mrb[4].mxu1 %v948_v8 }
 0x3ad   : > { %v1047_v21 = vpop.f32.mrb[0].mxu1 }
 0x3ae   : > { %v1053_v22 = vsub.f32 %v2616_v60, %v1047_v21  ;;  %v1631_v23 = vpop.f32.mrb[1].mxu1 }
 0x3af   : > { %v1050_v24 = vpop.f32.mrb[2].mxu1 }
 0x3b0   : > { %1054 = vst [vmem:[%s2552_s27] sm:$0xff] %v1053_v22  ;;  %v1632_v25 = vpop.f32.mrb[3].mxu1 }
 0x3cd   : > { %v1257_v28 = vpop.f32.mrb[4].mxu1 }
 0x3ce   : > { %v1263_v29 = vsub.f32 %v1153_v17, %v1257_v28  ;;  %v1671_v30 = vpop.f32.mrb[5].mxu1 }
 0x3cf   : > { %v1260_v31 = vpop.f32.mrb[6].mxu1 }
 0x3d0   : > { %1264 = vst [vmem:[%s2550_s28] sm:$0xff] %v1263_v29  ;;  %v1672_v32 = vpop.f32.mrb[7].mxu1 }
 0x3d1 PF: > { %s2800_s11 = sld [smem:[#allocation31_spill]]  ;;  %s2801_s30 = sld [smem:[#allocation36_spill]] }
 0x3d2   : > { %s2802_s17 = sld [smem:[#allocation41_spill]]  ;;  %s1284_s21 = sshll.u32 %s2550_s28, 4  ;;  %s1285_s21 = int_to_ptr.vmem [resolvable:$true] %s1284_s21 }
 0x3d3   : > { %s1266_s7 = scalar_lea.sflag [#allocation5], %s2540_s26  ;;  %s2012_s29 = scalar_lea.vmem %s1285_s21, 128 }
 0x3d4   : > { %p2013_p11 = scmp.ne.s32.totalorder %s1285_s21, %s2012_s29  ;;  %s2203_s20 = smov [#allocation14]  }
 0x3d5   : > { %s2016_s25 = sshll.u32 %s2203_s20, 4  ;;  %s2017_s25 = int_to_ptr.vmem [resolvable:$false] %s2016_s25 }
 0x3d6   : > { %s2018_s8 = scalar_lea.vmem %s2017_s25, 256  ;;  %p2019_p4 = scmp.lt.s32.totalorder %s1285_s21, %s2017_s25 }
 0x3d7   : > { %s1552_s23 = sshll.u32 %s2800_s11, 7  ;;  %p2803_p6 = scmp.ne.s32.totalorder %s2801_s30, 0 }
 0x3d8   : > { %s2647_s19 = scalar_lea.hbm %s2802_s17, %s1552_s23  ;;  %p2020_p9 = scmp.lt.s32.totalorder %s2018_s8, %s2012_s29 }
 0x3d9   : > { %p2014_p12 = pnand %p2013_p11, %p2803_p6 }
 0x3da   : > { %p2021_p5 = por %p2020_p9, %p2019_p4 }
 0x3db   : > { %p2015_p7 = pneg %p2014_p12 }
 0x3dd   : > { %p2022_p10 = pnand %p2021_p5, %p2015_p7 }
 0x3df   : > { %2025 = shalt.err (!%p2022_p10)
}
 0x3e0   : > { %s2026_s18 = scalar_lea.hbm %s2647_s19, 128  ;;  %s2030_s12 = scalar_lea.hbm %s2802_s17, 256 }
 0x3e1   : > { %p2027_p13 = scmp.ne.s32.totalorder %s2647_s19, %s2026_s18  ;;  %p2031_p2 = scmp.lt.u32.totalorder %s2647_s19, %s2802_s17 }
 0x3e2   : > { %p2032_p8 = scmp.lt.u32.totalorder %s2030_s12, %s2026_s18  ;;  %p2034_p11 = scmp.lt.u32.totalorder %s2026_s18, %s2647_s19 }
 0x3e3   : > { %p2028_p0 = pnand %p2027_p13, %p2803_p6 }
 0x3e4   : > { %p2033_p3 = por %p2032_p8, %p2031_p2 }
 0x3e5   : > { %p2029_p1 = pneg %p2028_p0 }
 0x3e6   : > { %p2035_p12 = por %p2034_p11, %p2033_p3 }
 0x3e8   : > { %p2036_p7 = pnand %p2035_p12, %p2029_p1 }
 0x3ea   : > { %2039 = shalt.err (!%p2036_p7)
}
 0x3eb   : > { %1700 = dma.vmem_to_hbm [thread:$0]  (%p2803_p6), %s1285_s21, 128, %s2647_s19, %s1266_s7  }
 0x3ec   : > { %s2804_s20 = sld [smem:[#allocation42_spill]]  ;;  %s1297_s8 = sshll.u32 %s2552_s27, 4  ;;  %s1298_s8 = int_to_ptr.vmem [resolvable:$true] %s1297_s8 }
 0x3ed   : > { %s1271_s18 = scalar_lea.sflag [#allocation16], %s2540_s26  ;;  %s2040_s2 = scalar_lea.vmem %s1298_s8, 128 }
 0x3ee   : > { %p2041_p4 = scmp.ne.s32.totalorder %s1298_s8, %s2040_s2  ;;  %s2204_s28 = smov [#allocation15]  }
 0x3ef   : > { %s2044_s12 = sshll.u32 %s2204_s28, 4  ;;  %s2045_s12 = int_to_ptr.vmem [resolvable:$false] %s2044_s12 }
 0x3f0   : > { %p2042_p9 = pnand %p2041_p4, %p2803_p6  ;;  %s2046_s24 = scalar_lea.vmem %s2045_s12, 256 }
 0x3f1   : > { %p2047_p10 = scmp.lt.s32.totalorder %s1298_s8, %s2045_s12  ;;  %p2048_p13 = scmp.lt.s32.totalorder %s2046_s24, %s2040_s2 }
 0x3f2   : > { %s2673_s25 = scalar_lea.hbm %s2804_s20, %s1552_s23  ;;  %p2043_p5 = pneg %p2042_p9 }
 0x3f3   : > { %p2049_p0 = por %p2048_p13, %p2047_p10 }
 0x3f5   : > { %p2050_p1 = pnand %p2049_p0, %p2043_p5 }
 0x3f7   : > { %2053 = shalt.err (!%p2050_p1)
}
 0x3f8   : > { %s2054_s26 = scalar_lea.hbm %s2673_s25, 128  ;;  %s2058_s23 = scalar_lea.hbm %s2804_s20, 256 }
 0x3f9   : > { %p2055_p2 = scmp.ne.s32.totalorder %s2673_s25, %s2054_s26  ;;  %p2059_p11 = scmp.lt.u32.totalorder %s2673_s25, %s2804_s20 }
 0x3fa   : > { %p2060_p12 = scmp.lt.u32.totalorder %s2058_s23, %s2054_s26  ;;  %p2062_p4 = scmp.lt.u32.totalorder %s2054_s26, %s2673_s25 }
 0x3fb   : > { %p2056_p8 = pnand %p2055_p2, %p2803_p6 }
 0x3fc   : > { %p2061_p7 = por %p2060_p12, %p2059_p11 }
 0x3fd   : > { %p2057_p3 = pneg %p2056_p8 }
 0x3fe   : > { %p2063_p9 = por %p2062_p4, %p2061_p7 }
 0x400   : > { %p2064_p5 = pnand %p2063_p9, %p2057_p3 }
 0x402   : > { %2067 = shalt.err (!%p2064_p5)
}
 0x403   : > { %1701 = dma.vmem_to_hbm [thread:$0]  (%p2803_p6), %s1298_s8, 128, %s2673_s25, %s1271_s18  }
 0x404 PF: > { %s2805_s7 = sld [smem:[#allocation27_spill]]  ;;  %s2806_s22 = sld [smem:[#allocation39_spill]] }
 0x405   : > { %p1732_p10 = scmp.ge.s32.totalorder %s2182_s15, 2 }
 0x40a   : > { %s1309_s16 = sand.u32 1, %s2805_s7   ;;  %p2807_p13 = scmp.ne.s32.totalorder %s2806_s22, 0 }
 0x40b   : > { %s1310_s29 = scalar_lea.sflag [#allocation5], %s1309_s16 }
 0x40c   : > { %p1718_p0 = pnand %p1732_p10, %p2807_p13 }
 0x40e   : > { %2133 = dma.done.wait (!%p1718_p0), %s1310_s29, 128  }
 0x40f   : > { %2135 = vsyncadd (!%p1718_p0), %s1310_s29, 4294967168  ;;  %s1319_s2 = scalar_lea.sflag [#allocation16], %s1309_s16 }
 0x410   : > { %2137 = dma.done.wait (!%p1718_p0), %s1319_s2, 128  }
 0x411   : > { %2139 = vsyncadd (!%p1718_p0), %s1319_s2, 4294967168  ;;  %s33_s15 = sadd.s32 1, %s2182_s15   ;;  %s2808_s27 = sld [smem:[#allocation28_spill]] }
 0x412   : > { %p30_p1 = scmp.ge.s32.totalorder %s33_s15, 6   ;;  %s2809_s28 = sld [smem:[#allocation29_spill]] }
 0x413   : > { %s2810_s29 = sld [smem:[#allocation37_spill]]  ;;  %s2811_s25 = sld [smem:[#allocation38_spill]] }
 0x414   : > { %s2812_s8 = sld [smem:[#allocation33_spill]]  ;;  %s2813_s18 = sld [smem:[#allocation34_spill]] }
 0x415   : > { %s2814_s30 = smov %s2158_s9  ;;  %s2815_s9 = smov %s2162_s10 }
 0x416   : > { %s2817_s11 = smov %s2174_s13  ;;  %s2818_s12 = smov %s2178_s14 }
 0x417   :  { %32 = sbr.rel (!%p30_p1) target bundleno = 19 (0x13), region = 155 }
 0x419   : > { %s2816_s10 = smov %s2811_s25 }
 0x41a   : > { %s2819_s13 = smov %s2812_s8  ;;  %s2820_s14 = smov %s2813_s18 }
 0x41e   :  { %1324 = vsyncpa [#allocation4], 1 }
 0x41f   :  { %1326 = vsyncpa [#allocation4 + $0x1], 1 }
 0x420   :  { %1327 = vsyncpa [#allocation7], 1 }
 0x421   :  { %1329 = vsyncpa [#allocation7 + $0x1], 1 }
 0x422   :  { %1330 = vsyncpa [#allocation10], 1 }
 0x423   :  { %1331 = vsyncpa [#allocation13], 1 }
 0x424   :  { %1332 = vsyncpa [#allocation5], 1 }
 0x425   :  { %1334 = vsyncpa [#allocation5 + $0x1], 1 }
 0x426   :  { %1335 = vsyncpa [#allocation16], 1 }
 0x427   :  { %1337 = vsyncpa [#allocation16 + $0x1], 1 }

</bundles_post_ra>
